<compile_context>
chip_gen: v7x
topology: tpu7x:2x2x1
jax: 0.10.0
libtpu: 0.0.40
codegen_flags: <defaults>
</compile_context>

<pallas_src>
import functools
import math

import jax
import jax.numpy as jnp
from jax.experimental import pallas as pl
from jax.experimental.pallas import tpu as pltpu

LANE = 128


# ------------------------------ Pallas kernel ------------------------------ #

def gcn_layer_kernel(a_ref, x_ref, w_ref, b_ref, o_ref, acc_ref, *,
                     ax_first, relu):
    """One GCN layer grid step:  out = [relu](A @ X @ W + b).

    Grid = (row blocks of A/out ["parallel"], reduction blocks over nodes
    ["arbitrary", last]).  acc_ref is an f32 VMEM accumulator resident across
    the reduction axis.  ax_first picks the cheaper association (padded dims):
      True  : accumulate A@X (bm, fin_p);  apply @W + b at finalize
      False : accumulate A@(X@W) (bm, fout_p);  apply + b at finalize
    """
    k = pl.program_id(1)

    @pl.when(k == 0)
    def _init():
        acc_ref[...] = jnp.zeros_like(acc_ref)

    # A arrives as f32 (dominant n^2 operand: no standalone wrapper cast pass);
    # cast to bf16 exactly once per tile, hidden under the tile DMA.
    a_blk = a_ref[...].astype(jnp.bfloat16)

    if ax_first:
        acc_ref[...] += jnp.dot(a_blk, x_ref[...],
                                preferred_element_type=jnp.float32)
    else:
        xw = jnp.dot(x_ref[...], w_ref[...],
                     preferred_element_type=jnp.float32)
        acc_ref[...] += jnp.dot(a_blk, xw.astype(jnp.bfloat16),
                                preferred_element_type=jnp.float32)

    @pl.when(k == pl.num_programs(1) - 1)
    def _finalize():
        if ax_first:
            out = jnp.dot(acc_ref[...].astype(jnp.bfloat16), w_ref[...],
                          preferred_element_type=jnp.float32)
        else:
            out = acc_ref[...]
        out = out + b_ref[...]            # bias-add / ReLU stay f32 (v5e VPU)
        if relu:
            out = jnp.maximum(out, 0.0)
        o_ref[...] = out.astype(o_ref.dtype)


# ------------------------- per-layer pallas_call glue ----------------------- #

def gcn_layer(a_p, x_p, w_p, b_p, *, relu, out_dtype, block_m, block_k):
    n_p = a_p.shape[0]
    fin_p = x_p.shape[1]
    fout_p = w_p.shape[1]
    grid_m, grid_k = n_p // block_m, n_p // block_k
    ax_first = fin_p < fout_p                      # decided on PADDED dims
    acc_cols = fin_p if ax_first else fout_p

    if ax_first:
        flops = 2 * n_p * n_p * fin_p + 2 * n_p * fin_p * fout_p
    else:
        flops = 2 * n_p * n_p * fout_p + 2 * grid_m * n_p * fin_p * fout_p
    out_bytes = n_p * fout_p * jnp.dtype(out_dtype).itemsize
    bytes_accessed = (4 * n_p * n_p                           # A (f32, once)
                      + 2 * grid_m * n_p * fin_p              # X (bf16, per row blk)
                      + 2 * grid_m * grid_k * fin_p * fout_p  # W (bf16, per step)
                      + 4 * fout_p + out_bytes)

    kernel = functools.partial(gcn_layer_kernel, ax_first=ax_first, relu=relu)
    return pl.pallas_call(
        kernel,
        out_shape=jax.ShapeDtypeStruct((n_p, fout_p), out_dtype),
        grid_spec=pltpu.PrefetchScalarGridSpec(
            num_scalar_prefetch=0,
            grid=(grid_m, grid_k),                            # reduction axis last
            in_specs=[
                pl.BlockSpec((block_m, block_k), lambda i, k: (i, k)),   # A  (f32)
                pl.BlockSpec((block_k, fin_p), lambda i, k: (k, 0)),     # X  (bf16)
                pl.BlockSpec((fin_p, fout_p), lambda i, k: (0, 0)),      # W  (bf16)
                pl.BlockSpec((1, fout_p), lambda i, k: (0, 0)),          # b  (f32)
            ],
            out_specs=pl.BlockSpec((block_m, fout_p), lambda i, k: (i, 0)),
            scratch_shapes=[pltpu.VMEM((block_m, acc_cols), jnp.float32)],
        ),
        compiler_params=pltpu.CompilerParams(
            dimension_semantics=("parallel", "arbitrary"),    # rows split over TCs (v7x)
            vmem_limit_bytes=48 * 1024 * 1024),
        cost_estimate=pl.CostEstimate(flops=flops, transcendentals=0,
                                      bytes_accessed=bytes_accessed),
    )(a_p, x_p, w_p, b_p)


# --------------------------- Model (plain-JAX glue) ------------------------- #

def _round_up(v, m):
    return ((v + m - 1) // m) * m


def _pad2(a, shape):
    pads = [(0, s - d) for d, s in zip(a.shape, shape)]
    return jnp.pad(a, pads) if any(p for _, p in pads) else a


@functools.partial(jax.jit, static_argnames=("block_m", "block_k"))
def gnn_forward(a_hat, x, params, *, block_m=256, block_k=512):
    """AbstractGNNModel.forward for a dense GCN stack in eval mode
    (pooling=None, dropout=identity).  Returns the last layer's pre-activation
    z, exactly as the reference module does."""
    n = a_hat.shape[0]
    # Node dim padded with zero rows/cols so both grid axes divide exactly
    # (padded rows/cols are exactly zero in A, so real-node results are exact).
    n_p = _round_up(n, math.lcm(block_m, block_k))

    a_p = _pad2(a_hat.astype(jnp.float32), (n_p, n_p))   # stays f32, cast in-kernel
    fin0_p = _round_up(params[0][0].shape[0], LANE)
    h = _pad2(x, (n_p, fin0_p)).astype(jnp.bfloat16)

    num_layers = len(params)
    for idx, (w, b) in enumerate(params):
        fin, fout = w.shape
        fin_p, fout_p = _round_up(fin, LANE), _round_up(fout, LANE)
        w_p = _pad2(w, (fin_p, fout_p)).astype(jnp.bfloat16)
        b_p = _pad2(b.reshape(1, -1), (1, fout_p)).astype(jnp.float32)
        last = idx == num_layers - 1
        # Hidden activations flow between layers as bf16 (cast exactly once in
        # the producing kernel's finalize); last layer is f32 pre-activation.
        h = gcn_layer(a_p, h, w_p, b_p,
                      relu=not last,
                      out_dtype=jnp.float32 if last else jnp.bfloat16,
                      block_m=block_m, block_k=block_k)
        # TODO(synk): training-mode dropout between layers would use
        # pltpu.prng_seed / pltpu.stateful_bernoulli; identity in eval mode.

    return h[:n, :params[-1][0].shape[1]]


def make_normalized_adjacency(key, num_nodes, edge_prob=0.15):
    """Dense symmetric adjacency with self loops, symmetrically normalized."""
    u = jax.random.uniform(key, (num_nodes, num_nodes))
    a = (u < edge_prob).astype(jnp.float32)
    a = jnp.maximum(a, a.T)                          # symmetric
    a = a + jnp.eye(num_nodes, dtype=jnp.float32)    # self loops -> deg >= 1
    a = jnp.minimum(a, 1.0)
    deg = jnp.sum(a, axis=1)
    d_inv_sqrt = 1.0 / jnp.sqrt(deg)
    return a * d_inv_sqrt[:, None] * d_inv_sqrt[None, :]


def init_params(key, layer_sizes):
    """layer_sizes: list of (in_feat, out_feat). Deterministic Glorot-ish init."""
    params = []
    for fin, fout in layer_sizes:
        kw, key = jax.random.split(key)
        scale = jnp.sqrt(2.0 / (fin + fout))
        w = scale * jax.random.normal(kw, (fin, fout), dtype=jnp.float32)
        b = jnp.zeros((1, fout), dtype=jnp.float32)
        params.append((w, b))
    return tuple(params)


# ---------------------------------- main ------------------------------------ #

if __name__ == "__main__":
    key = jax.random.PRNGKey(0)
    k_adj, k_feat, k_par = jax.random.split(key, 3)

    # Sizes chosen so the demo exercises: node padding (200 -> 256), a real
    # multi-step (2 x 2) grid with accumulator init/finalize, and BOTH
    # associativity paths (layer 1: 128 -> 256 padded; layer 2: 256 -> 128).
    num_nodes = 200
    in_feat, hidden, out_feat = 48, 160, 32

    a_hat = make_normalized_adjacency(k_adj, num_nodes)
    x = jax.random.normal(k_feat, (num_nodes, in_feat), dtype=jnp.float32)
    params = init_params(k_par, [(in_feat, hidden), (hidden, out_feat)])
    (w1, b1), (w2, b2) = params

    # Small block sizes only so the tiny demo still produces a multi-block
    # grid; for realistic graphs keep the defaults (256 x 512).
    out = gnn_forward(a_hat, x, params, block_m=128, block_k=128)
    out = jax.block_until_ready(out)

    # Pure-JAX f32 reference of the same forward (z = last-layer pre-activation).
    h_ref = jnp.maximum(a_hat @ x @ w1 + b1, 0.0)
    z_ref = a_hat @ h_ref @ w2 + b2

    assert out.shape == (num_nodes, out_feat)
    assert jnp.all(jnp.isfinite(out))
    max_err = float(jnp.max(jnp.abs(out - z_ref)))
    assert jnp.allclose(out, z_ref, atol=1e-1, rtol=1e-1), max_err
    print("KERNEL_OK")
</pallas_src>

<mosaic_0001>
module attributes {stable_mosaic.version = 11 : i64} {
  func.func @gcn_layer_kernel(%arg0: i32, %arg1: i32, %arg2: memref<128x128xf32, #tpu.memory_space<vmem>>, %arg3: memref<128x128xbf16, #tpu.memory_space<vmem>>, %arg4: memref<128x256xbf16, #tpu.memory_space<vmem>>, %arg5: memref<1x256xf32, #tpu.memory_space<vmem>>, %arg6: memref<128x256xbf16, #tpu.memory_space<vmem>>, %arg7: memref<128x128xf32, #tpu.memory_space<vmem>>) attributes {dimension_semantics = [#tpu.dimension_semantics<parallel>, #tpu.dimension_semantics<arbitrary>], iteration_bounds = array<i64: 2, 2>, scalar_prefetch = 0 : i64, scratch_operands = 1 : i64, tpu.core_type = #tpu.core_type<tc>, window_params = [{transform_indices = @transform_0, window_bounds = array<i64: 128, 128>}, {transform_indices = @transform_1, window_bounds = array<i64: 128, 128>}, {pipeline_mode = #tpu.pipeline_mode<synchronous>, transform_indices = @transform_2, window_bounds = array<i64: 128, 256>}, {pipeline_mode = #tpu.pipeline_mode<synchronous>, transform_indices = @transform_3, window_bounds = array<i64: 1, 256>}, {transform_indices = @transform_4, window_bounds = array<i64: 128, 256>}]} {
    %c0_i32 = arith.constant 0 : i32
    %0 = arith.cmpi eq, %arg1, %c0_i32 : i32
    %1 = arith.extui %0 : i1 to i32
    %c0_i32_0 = arith.constant 0 : i32
    %2 = arith.cmpi ne, %1, %c0_i32_0 : i32
    scf.if %2 {
      %cst_9 = arith.constant 0.000000e+00 : f32
      %13 = vector.broadcast %cst_9 : f32 to vector<128x128xf32>
      %c0_10 = arith.constant 0 : index
      %c0_11 = arith.constant 0 : index
      %14 = vector.load %arg7[%c0_10, %c0_11] : memref<128x128xf32, #tpu.memory_space<vmem>>, vector<128x128xf32>
      tpu.vector_store %arg7[%c0_10, %c0_11], %13 {strides = array<i32>} : memref<128x128xf32, #tpu.memory_space<vmem>>, vector<128x128xf32>,
    } else {
    }
    %c0 = arith.constant 0 : index
    %c0_1 = arith.constant 0 : index
    %3 = vector.load %arg2[%c0, %c0_1] : memref<128x128xf32, #tpu.memory_space<vmem>>, vector<128x128xf32>
    %4 = arith.truncf %3 : vector<128x128xf32> to vector<128x128xbf16>
    %c0_2 = arith.constant 0 : index
    %c0_3 = arith.constant 0 : index
    %5 = vector.load %arg7[%c0_2, %c0_3] : memref<128x128xf32, #tpu.memory_space<vmem>>, vector<128x128xf32>
    %c0_4 = arith.constant 0 : index
    %c0_5 = arith.constant 0 : index
    %6 = vector.load %arg3[%c0_4, %c0_5] : memref<128x128xbf16, #tpu.memory_space<vmem>>, vector<128x128xbf16>
    %cst = arith.constant dense<0.000000e+00> : vector<128x128xf32>
    %7 = tpu.matmul %4, %6, %cst {dimension_numbers = #tpu.dot_dimension_numbers<[1], [0], [0], [1], [0, 0, 1, 1], [], []>} : vector<128x128xbf16>, vector<128x128xbf16>, vector<128x128xf32> -> vector<128x128xf32>
    %8 = arith.addf %5, %7 : vector<128x128xf32>
    %c0_6 = arith.constant 0 : index
    %c0_7 = arith.constant 0 : index
    %9 = vector.load %arg7[%c0_6, %c0_7] : memref<128x128xf32, #tpu.memory_space<vmem>>, vector<128x128xf32>
    tpu.vector_store %arg7[%c0_6, %c0_7], %8 {strides = array<i32>} : memref<128x128xf32, #tpu.memory_space<vmem>>, vector<128x128xf32>,
    %c1_i32 = arith.constant 1 : i32
    %10 = arith.cmpi eq, %arg1, %c1_i32 : i32
    %11 = arith.extui %10 : i1 to i32
    %c0_i32_8 = arith.constant 0 : i32
    %12 = arith.cmpi ne, %11, %c0_i32_8 : i32
    scf.if %12 {
      %c0_9 = arith.constant 0 : index
      %c0_10 = arith.constant 0 : index
      %13 = vector.load %arg7[%c0_9, %c0_10] : memref<128x128xf32, #tpu.memory_space<vmem>>, vector<128x128xf32>
      %14 = arith.truncf %13 : vector<128x128xf32> to vector<128x128xbf16>
      %c0_11 = arith.constant 0 : index
      %c0_12 = arith.constant 0 : index
      %15 = vector.load %arg4[%c0_11, %c0_12] : memref<128x256xbf16, #tpu.memory_space<vmem>>, vector<128x256xbf16>
      %cst_13 = arith.constant dense<0.000000e+00> : vector<128x256xf32>
      %16 = tpu.matmul %14, %15, %cst_13 {dimension_numbers = #tpu.dot_dimension_numbers<[1], [0], [0], [1], [0, 0, 1, 1], [], []>} : vector<128x128xbf16>, vector<128x256xbf16>, vector<128x256xf32> -> vector<128x256xf32>
      %c0_14 = arith.constant 0 : index
      %c0_15 = arith.constant 0 : index
      %17 = vector.load %arg5[%c0_14, %c0_15] : memref<1x256xf32, #tpu.memory_space<vmem>>, vector<1x256xf32>
      %18 = vector.broadcast %17 : vector<1x256xf32> to vector<128x256xf32>
      %19 = arith.addf %16, %18 : vector<128x256xf32>
      %cst_16 = arith.constant 0.000000e+00 : f32
      %20 = vector.broadcast %cst_16 : f32 to vector<128x256xf32>
      %21 = arith.maximumf %19, %20 : vector<128x256xf32>
      %22 = arith.truncf %21 : vector<128x256xf32> to vector<128x256xbf16>
      %c0_17 = arith.constant 0 : index
      %c0_18 = arith.constant 0 : index
      %23 = vector.load %arg6[%c0_17, %c0_18] : memref<128x256xbf16, #tpu.memory_space<vmem>>, vector<128x256xbf16>
      tpu.vector_store %arg6[%c0_17, %c0_18], %22 {strides = array<i32>} : memref<128x256xbf16, #tpu.memory_space<vmem>>, vector<128x256xbf16>,
    } else {
    }
    return
  }
  func.func @transform_0(%arg0: i32, %arg1: i32) -> (i32, i32) {
    %c0_i32 = arith.constant 0 : i32
    return %arg0, %arg1 : i32, i32
  }
  func.func @transform_1(%arg0: i32, %arg1: i32) -> (i32, i32) {
    %c0_i32 = arith.constant 0 : i32
    %c0_i32_0 = arith.constant 0 : i32
    return %arg1, %c0_i32 : i32, i32
  }
  func.func @transform_2(%arg0: i32, %arg1: i32) -> (i32, i32) {
    %c0_i32 = arith.constant 0 : i32
    %c0_i32_0 = arith.constant 0 : i32
    %c0_i32_1 = arith.constant 0 : i32
    return %c0_i32, %c0_i32_0 : i32, i32
  }
  func.func @transform_3(%arg0: i32, %arg1: i32) -> (i32, i32) {
    %c0_i32 = arith.constant 0 : i32
    %c0_i32_0 = arith.constant 0 : i32
    %c0_i32_1 = arith.constant 0 : i32
    return %c0_i32, %c0_i32_0 : i32, i32
  }
  func.func @transform_4(%arg0: i32, %arg1: i32) -> (i32, i32) {
    %c0_i32 = arith.constant 0 : i32
    %c0_i32_0 = arith.constant 0 : i32
    return %arg0, %c0_i32 : i32, i32
  }
}

module attributes {stable_mosaic.version = 11 : i64} {
  func.func @gcn_layer_kernel(%arg0: i32, %arg1: i32, %arg2: memref<128x128xf32, #tpu.memory_space<vmem>>, %arg3: memref<128x256xbf16, #tpu.memory_space<vmem>>, %arg4: memref<256x128xbf16, #tpu.memory_space<vmem>>, %arg5: memref<1x128xf32, #tpu.memory_space<vmem>>, %arg6: memref<128x128xf32, #tpu.memory_space<vmem>>, %arg7: memref<128x128xf32, #tpu.memory_space<vmem>>) attributes {dimension_semantics = [#tpu.dimension_semantics<parallel>, #tpu.dimension_semantics<arbitrary>], iteration_bounds = array<i64: 2, 2>, scalar_prefetch = 0 : i64, scratch_operands = 1 : i64, tpu.core_type = #tpu.core_type<tc>, window_params = [{transform_indices = @transform_0, window_bounds = array<i64: 128, 128>}, {transform_indices = @transform_1, window_bounds = array<i64: 128, 256>}, {pipeline_mode = #tpu.pipeline_mode<synchronous>, transform_indices = @transform_2, window_bounds = array<i64: 256, 128>}, {pipeline_mode = #tpu.pipeline_mode<synchronous>, transform_indices = @transform_3, window_bounds = array<i64: 1, 128>}, {transform_indices = @transform_4, window_bounds = array<i64: 128, 128>}]} {
    %c0_i32 = arith.constant 0 : i32
    %0 = arith.cmpi eq, %arg1, %c0_i32 : i32
    %1 = arith.extui %0 : i1 to i32
    %c0_i32_0 = arith.constant 0 : i32
    %2 = arith.cmpi ne, %1, %c0_i32_0 : i32
    scf.if %2 {
      %cst_12 = arith.constant 0.000000e+00 : f32
      %16 = vector.broadcast %cst_12 : f32 to vector<128x128xf32>
      %c0_13 = arith.constant 0 : index
      %c0_14 = arith.constant 0 : index
      %17 = vector.load %arg7[%c0_13, %c0_14] : memref<128x128xf32, #tpu.memory_space<vmem>>, vector<128x128xf32>
      tpu.vector_store %arg7[%c0_13, %c0_14], %16 {strides = array<i32>} : memref<128x128xf32, #tpu.memory_space<vmem>>, vector<128x128xf32>,
    } else {
    }
    %c0 = arith.constant 0 : index
    %c0_1 = arith.constant 0 : index
    %3 = vector.load %arg2[%c0, %c0_1] : memref<128x128xf32, #tpu.memory_space<vmem>>, vector<128x128xf32>
    %4 = arith.truncf %3 : vector<128x128xf32> to vector<128x128xbf16>
    %c0_2 = arith.constant 0 : index
    %c0_3 = arith.constant 0 : index
    %5 = vector.load %arg3[%c0_2, %c0_3] : memref<128x256xbf16, #tpu.memory_space<vmem>>, vector<128x256xbf16>
    %c0_4 = arith.constant 0 : index
    %c0_5 = arith.constant 0 : index
    %6 = vector.load %arg4[%c0_4, %c0_5] : memref<256x128xbf16, #tpu.memory_space<vmem>>, vector<256x128xbf16>
    %cst = arith.constant dense<0.000000e+00> : vector<128x128xf32>
    %7 = tpu.matmul %5, %6, %cst {dimension_numbers = #tpu.dot_dimension_numbers<[1], [0], [0], [1], [0, 0, 1, 1], [], []>} : vector<128x256xbf16>, vector<256x128xbf16>, vector<128x128xf32> -> vector<128x128xf32>
    %c0_6 = arith.constant 0 : index
    %c0_7 = arith.constant 0 : index
    %8 = vector.load %arg7[%c0_6, %c0_7] : memref<128x128xf32, #tpu.memory_space<vmem>>, vector<128x128xf32>
    %9 = arith.truncf %7 : vector<128x128xf32> to vector<128x128xbf16>
    %cst_8 = arith.constant dense<0.000000e+00> : vector<128x128xf32>
    %10 = tpu.matmul %4, %9, %cst_8 {dimension_numbers = #tpu.dot_dimension_numbers<[1], [0], [0], [1], [0, 0, 1, 1], [], []>} : vector<128x128xbf16>, vector<128x128xbf16>, vector<128x128xf32> -> vector<128x128xf32>
    %11 = arith.addf %8, %10 : vector<128x128xf32>
    %c0_9 = arith.constant 0 : index
    %c0_10 = arith.constant 0 : index
    %12 = vector.load %arg7[%c0_9, %c0_10] : memref<128x128xf32, #tpu.memory_space<vmem>>, vector<128x128xf32>
    tpu.vector_store %arg7[%c0_9, %c0_10], %11 {strides = array<i32>} : memref<128x128xf32, #tpu.memory_space<vmem>>, vector<128x128xf32>,
    %c1_i32 = arith.constant 1 : i32
    %13 = arith.cmpi eq, %arg1, %c1_i32 : i32
    %14 = arith.extui %13 : i1 to i32
    %c0_i32_11 = arith.constant 0 : i32
    %15 = arith.cmpi ne, %14, %c0_i32_11 : i32
    scf.if %15 {
      %c0_12 = arith.constant 0 : index
      %c0_13 = arith.constant 0 : index
      %16 = vector.load %arg7[%c0_12, %c0_13] : memref<128x128xf32, #tpu.memory_space<vmem>>, vector<128x128xf32>
      %c0_14 = arith.constant 0 : index
      %c0_15 = arith.constant 0 : index
      %17 = vector.load %arg5[%c0_14, %c0_15] : memref<1x128xf32, #tpu.memory_space<vmem>>, vector<1x128xf32>
      %18 = vector.broadcast %17 : vector<1x128xf32> to vector<128x128xf32>
      %19 = arith.addf %16, %18 : vector<128x128xf32>
      %c0_16 = arith.constant 0 : index
      %c0_17 = arith.constant 0 : index
      %20 = vector.load %arg6[%c0_16, %c0_17] : memref<128x128xf32, #tpu.memory_space<vmem>>, vector<128x128xf32>
      tpu.vector_store %arg6[%c0_16, %c0_17], %19 {strides = array<i32>} : memref<128x128xf32, #tpu.memory_space<vmem>>, vector<128x128xf32>,
    } else {
    }
    return
  }
  func.func @transform_0(%arg0: i32, %arg1: i32) -> (i32, i32) {
    %c0_i32 = arith.constant 0 : i32
    return %arg0, %arg1 : i32, i32
  }
  func.func @transform_1(%arg0: i32, %arg1: i32) -> (i32, i32) {
    %c0_i32 = arith.constant 0 : i32
    %c0_i32_0 = arith.constant 0 : i32
    return %arg1, %c0_i32 : i32, i32
  }
  func.func @transform_2(%arg0: i32, %arg1: i32) -> (i32, i32) {
    %c0_i32 = arith.constant 0 : i32
    %c0_i32_0 = arith.constant 0 : i32
    %c0_i32_1 = arith.constant 0 : i32
    return %c0_i32, %c0_i32_0 : i32, i32
  }
  func.func @transform_3(%arg0: i32, %arg1: i32) -> (i32, i32) {
    %c0_i32 = arith.constant 0 : i32
    %c0_i32_0 = arith.constant 0 : i32
    %c0_i32_1 = arith.constant 0 : i32
    return %c0_i32, %c0_i32_0 : i32, i32
  }
  func.func @transform_4(%arg0: i32, %arg1: i32) -> (i32, i32) {
    %c0_i32 = arith.constant 0 : i32
    %c0_i32_0 = arith.constant 0 : i32
    return %arg0, %c0_i32 : i32, i32
  }
}

</mosaic_0001>

<bundles_post_ra>
// kernel: gnn_forward.2
= control target key start
LH: loop header
LB: loop body
LE: loop exit
PB: predicated region body
PF: predicated region fallthrough
CT: control target
= control target key end

     0   :  { %s1402_s15 = smov 0   ;;  %s1404_s16 = smov 0   ;;  %s1655_s0 = inlined_call_operand.vmem [shape: f32[256,256], index: 0, kind: input, shape index: {}]   ;;  %s1656_s1 = inlined_call_operand.vmem [shape: bf16[256,128], index: 1, kind: input, shape index: {}]   ;;  %s1657_s2 = inlined_call_operand.vmem [shape: bf16[128,256], index: 2, kind: input, shape index: {}]   ;;  %s1658_s3 = inlined_call_operand.vmem [shape: f32[1,256], index: 3, kind: input, shape index: {}]   ;;  %s1659_s4 = inlined_call_operand.vmem [shape: bf16[256,256], index: 4, kind: output, shape index: {}]  }
   0x1   :  { %s1406_s17 = smov 0   ;;  %s1408_s18 = smov 0  }
   0x2   :  { %s1410_s19 = smov 0   ;;  %s1412_s20 = smov 0  }
   0x3   :  { %s1414_s21 = smov 0  }
   0x4 LB: > { %s23_s22 = sadd.s32 1, %s1365_s19  ;;  %s26_s23 = sadd.s32 1, %s1369_s20  ;;  %s1373_s21 = sphi %s1414_s21, %s14_s21   ;;  %s1369_s20 = sphi %s1412_s20, %s1665_s20   ;;  %s1365_s19 = sphi %s1410_s19, %s1664_s19   ;;  %s1361_s18 = sphi %s1408_s18, %s1663_s18   ;;  %s1357_s17 = sphi %s1406_s17, %s1662_s17   ;;  %s1353_s16 = sphi %s1404_s16, %s1661_s16   ;;  %s1349_s15 = sphi %s1402_s15, %s1660_s15  }
   0x5   : > { %p24_p0 = scmp.ge.s32.totalorder %s23_s22, 2  ;;  %p42_p1 = scmp.ne.s32.totalorder %s1353_s16, %s1349_s15 }
   0x6   : > { %p43_p2 = scmp.eq.s32.totalorder %s1373_s21, 0  ;;  %s35_s27 = sadd.s32 1, %s1353_s16 }
   0x7   : > { %s1667_s22 = smov (%p24_p0, %s23_s22), 0  ;;  %s1669_s23 = smov (!%p24_p0, %s26_s23), %s1369_s20 }
   0x8   : > { %p44_p3 = por %p43_p2, %p42_p1  ;;  %p28_p4 = scmp.ge.s32.totalorder %s1669_s23, 2 }
   0x9   : > { %s31_s24 = ssub.s32 %s1365_s19, %s1667_s22  ;;  %p1075_p6 = scmp.ge.s32.totalorder %s1373_s21, 4 }
   0xa   : > { %s1671_s23 = smov (%p28_p4, %s1669_s23), 0 }
   0xb   : > { %s30_s25 = ssub.s32 %s1369_s20, %s1671_s23  ;;  %168 = sbr.rel (%p1075_p6) target bundleno = 32 (0x20), region = 24 }
   0xc   : > { %s32_s26 = sor.u32 %s31_s24, %s30_s25 }
   0xd   : > { %p33_p5 = scmp.eq.s32.totalorder %s32_s26, 0 }
   0xf   : > { %s1453_s28 = scalar_select %p33_p5, %s1353_s16, %s35_s27  }
  0x12   : > { %171 = sbr.rel (!%p44_p3) target bundleno = 32 (0x20), region = 28  ;;  %s173_s29 = sand.u32 (%p44_p3), 1, %s1353_s16  }
  0x13   : > { %s1131_s30 = sshll.u32 (%p44_p3), %s1369_s20, 5  ;;  %s1076_s5 = sshll.u32 (%p44_p3), %s173_s29, 7 }
  0x14   : > { %s178_s6 = sadd.s32 (%p44_p3), %s1365_s19, %s1131_s30  ;;  %s175_s11 = scalar_lea.vmem (%p44_p3), [#allocation3], %s1076_s5 }
  0x15   : > { %s1079_s7 = sshll.u32 (%p44_p3), %s178_s6, 3 }
  0x16   : > { %s1462_s10 = scalar_lea.vmem (%p44_p3), %s1655_s0, %s1079_s7 }
  0x17   : > { %v238_v0 = vld [vmem:[%s1462_s10] sm:$0xff] (%p44_p3)  ;;  %v240_v1 = vld [vmem:[%s1462_s10 + $0x10] sm:$0xff] (%p44_p3) }
  0x18   : > { %v242_v2 = vld [vmem:[%s1462_s10 + $0x20] sm:$0xff] (%p44_p3)  ;;  %239 = vst [vmem:[%s175_s11] sm:$0xff] (%p44_p3), %v238_v0  ;;  %241 = vst [vmem:[%s175_s11 + $0x8] sm:$0xff] (%p44_p3), %v240_v1  ;;  %v244_v3 = vld [vmem:[%s1462_s10 + $0x30] sm:$0xff] (%p44_p3) }
  0x19   : > { %243 = vst [vmem:[%s175_s11 + $0x10] sm:$0xff] %v242_v2  ;;  %v246_v4 = vld [vmem:[%s1462_s10 + $0x40] sm:$0xff]  ;;  %v248_v5 = vld [vmem:[%s1462_s10 + $0x50] sm:$0xff]  ;;  %245 = vst [vmem:[%s175_s11 + $0x18] sm:$0xff] %v244_v3 }
  0x1a   : > { %247 = vst [vmem:[%s175_s11 + $0x20] sm:$0xff] %v246_v4  ;;  %249 = vst [vmem:[%s175_s11 + $0x28] sm:$0xff] %v248_v5  ;;  %v250_v6 = vld [vmem:[%s1462_s10 + $0x60] sm:$0xff]  ;;  %v252_v7 = vld [vmem:[%s1462_s10 + $0x70] sm:$0xff] }
  0x1b   : > { %v254_v8 = vld [vmem:[%s1462_s10 + $0x80] sm:$0xff]  ;;  %251 = vst [vmem:[%s175_s11 + $0x30] sm:$0xff] %v250_v6  ;;  %253 = vst [vmem:[%s175_s11 + $0x38] sm:$0xff] %v252_v7  ;;  %v256_v9 = vld [vmem:[%s1462_s10 + $0x90] sm:$0xff] }
  0x1c   : > { %255 = vst [vmem:[%s175_s11 + $0x40] sm:$0xff] %v254_v8  ;;  %v258_v10 = vld [vmem:[%s1462_s10 + $0xa0] sm:$0xff]  ;;  %v260_v11 = vld [vmem:[%s1462_s10 + $0xb0] sm:$0xff]  ;;  %257 = vst [vmem:[%s175_s11 + $0x48] sm:$0xff] %v256_v9 }
  0x1d   : > { %259 = vst [vmem:[%s175_s11 + $0x50] sm:$0xff] %v258_v10  ;;  %261 = vst [vmem:[%s175_s11 + $0x58] sm:$0xff] %v260_v11  ;;  %v262_v12 = vld [vmem:[%s1462_s10 + $0xc0] sm:$0xff]  ;;  %v264_v13 = vld [vmem:[%s1462_s10 + $0xd0] sm:$0xff] }
  0x1e   : > { %v266_v14 = vld [vmem:[%s1462_s10 + $0xe0] sm:$0xff]  ;;  %263 = vst [vmem:[%s175_s11 + $0x60] sm:$0xff] %v262_v12  ;;  %265 = vst [vmem:[%s175_s11 + $0x68] sm:$0xff] %v264_v13  ;;  %v268_v15 = vld [vmem:[%s1462_s10 + $0xf0] sm:$0xff] }
  0x1f   : > { %267 = vst [vmem:[%s175_s11 + $0x70] sm:$0xff] %v266_v14  ;;  %269 = vst [vmem:[%s175_s11 + $0x78] sm:$0xff] %v268_v15 }
  0x20 PF: > { %p1080_p7 = scmp.ge.s32.totalorder %s1373_s21, 1  ;;  %p283_p8 = scmp.lt.s32.totalorder %s1373_s21, 5 }
  0x22   : > { %p284_p9 = pnand %p1080_p7, %p283_p8 }
  0x23   : > { %s290_s12 = sand.u32 (!%p284_p9), 1, %s1349_s15   ;;  %s1082_s13 = sshll.u32 (!%p284_p9), %s1357_s17, 4 }
  0x24   : > { %287 = sbr.rel (%p284_p9) target bundleno = 560 (0x230), region = 70  ;;  %s1081_s14 = sshll.u32 (!%p284_p9), %s290_s12, 7 }
  0x25   : > { %p323_p10 = scmp.lt.s32.totalorder (!%p284_p9), %s1082_s13, 31  ;;  %s1084_s24 = sshll.u32 (!%p284_p9), %s1361_s18, 4 }
  0x26   : > { %p329_p11 = scmp.lt.s32.totalorder (!%p284_p9), %s1084_s24, 31  ;;  %s1495_s15 = scalar_lea.vmem (!%p284_p9), [#allocation3], %s1081_s14 }
  0x27   : > { %p1087_p12 = scmp.ne.s32.totalorder (!%p284_p9), %s1357_s17, 0 }
  0x2b   : > { %s1673_s13 = smov (!%p323_p10, %s1082_s13), 31  ;;  %s1675_s24 = smov (!%p329_p11, %s1084_s24), 31 }
  0x2c   : > { %s1083_s25 = sshll.u32 %s1673_s13, 2  ;;  %s1132_s30 = sshll.u32 %s1675_s24, 3  ;;  %v1375_v16 = vmov (!%p1087_p12), 0.0  }
  0x2d   : > { %s1488_s29 = scalar_lea.vmem %s1656_s1, %s1083_s25  ;;  %s1493_s7 = scalar_lea.vmem %s1659_s4, %s1132_s30  ;;  %340 = vst [vmem:[#allocation2] sm:$0xff] (!%p1087_p12), %v1375_v16  ;;  %341 = vst [vmem:[#allocation2 + $0x8] sm:$0xff] (!%p1087_p12), %v1375_v16 }
  0x2e   : > { %339 = sbr.rel (%p1087_p12) target bundleno = 53 (0x35), region = 78  ;;  %342 = vst [vmem:[#allocation2 + $0x10] sm:$0xff] (!%p1087_p12), %v1375_v16  ;;  %343 = vst [vmem:[#allocation2 + $0x18] sm:$0xff] (!%p1087_p12), %v1375_v16 }
  0x2f   : > { %344 = vst [vmem:[#allocation2 + $0x20] sm:$0xff] (!%p1087_p12), %v1375_v16  ;;  %345 = vst [vmem:[#allocation2 + $0x28] sm:$0xff] (!%p1087_p12), %v1375_v16 }
  0x30   : > { %346 = vst [vmem:[#allocation2 + $0x30] sm:$0xff] (!%p1087_p12), %v1375_v16  ;;  %347 = vst [vmem:[#allocation2 + $0x38] sm:$0xff] (!%p1087_p12), %v1375_v16 }
  0x31   : > { %348 = vst [vmem:[#allocation2 + $0x40] sm:$0xff] (!%p1087_p12), %v1375_v16  ;;  %349 = vst [vmem:[#allocation2 + $0x48] sm:$0xff] (!%p1087_p12), %v1375_v16 }
  0x32   : > { %350 = vst [vmem:[#allocation2 + $0x50] sm:$0xff] (!%p1087_p12), %v1375_v16  ;;  %351 = vst [vmem:[#allocation2 + $0x58] sm:$0xff] (!%p1087_p12), %v1375_v16 }
  0x33   : > { %352 = vst [vmem:[#allocation2 + $0x60] sm:$0xff] (!%p1087_p12), %v1375_v16  ;;  %353 = vst [vmem:[#allocation2 + $0x68] sm:$0xff] (!%p1087_p12), %v1375_v16 }
  0x34   : > { %354 = vst [vmem:[#allocation2 + $0x70] sm:$0xff] (!%p1087_p12), %v1375_v16  ;;  %355 = vst [vmem:[#allocation2 + $0x78] sm:$0xff] (!%p1087_p12), %v1375_v16 }
  0x35 PF: > { %v1287_v17 = vld [vmem:[%s1488_s29] sm:$0xff]   ;;  %v1288_v18 = vld [vmem:[%s1488_s29 + $0x8] sm:$0xff]   ;;  %v1289_v19 = vld [vmem:[%s1488_s29 + $0x10] sm:$0xff]   ;;  %p1096_p13 = scmp.ne.s32.totalorder %s1357_s17, 1 }
  0x36   : > { %1165 = vmatprep.subr.bf16.mxu0 %v1287_v17  ;;  %1197 = vmatprep.subr.bf16.mxu1 %v1287_v17  ;;  %v1290_v20 = vld [vmem:[%s1488_s29 + $0x18] sm:$0xff]   ;;  %v356_v21 = vld [vmem:[%s1495_s15] sm:$0xff]  ;;  %v357_v22 = vld [vmem:[%s1495_s15 + $0x8] sm:$0xff] }
  0x37   : > { %1166 = vmatpush3.bf16.msra.mxu0 %v1287_v17  ;;  %1205 = vmatpush3.bf16.msra.mxu1 %v1287_v17  ;;  %v364_v23 = vld [vmem:[%s1495_s15 + $0x40] sm:$0xff]  ;;  %v372_v24 = vpack.c.bf16 %v357_v22, %v356_v21  ;;  %v365_v25 = vld [vmem:[%s1495_s15 + $0x48] sm:$0xff]  ;;  %v1293_v29 = vld [vmem:[%s1488_s29 + $0x30] sm:$0xff]  }
  0x38   : > { %1167 = vmatprep.subr.bf16.mxu0 %v1288_v18  ;;  %1198 = vmatprep.subr.bf16.mxu1 %v1288_v18  ;;  %v376_v26 = vpack.c.bf16 %v365_v25, %v364_v23  ;;  %v1291_v27 = vld [vmem:[%s1488_s29 + $0x20] sm:$0xff]   ;;  %v1292_v28 = vld [vmem:[%s1488_s29 + $0x28] sm:$0xff]   ;;  %v1294_v30 = vld [vmem:[%s1488_s29 + $0x38] sm:$0xff]  }
  0x39   : > { %1181 = vmatprep.mubr.bf16.mxu0 %v372_v24  ;;  %v358_v31 = vld [vmem:[%s1495_s15 + $0x10] sm:$0xff]  ;;  %v359_v32 = vld [vmem:[%s1495_s15 + $0x18] sm:$0xff]  ;;  %v360_v35 = vld [vmem:[%s1495_s15 + $0x20] sm:$0xff] }
  0x3a   : > { %1189 = vmatprep.mubr.bf16.mxu1 %v376_v26  ;;  %v366_v33 = vld [vmem:[%s1495_s15 + $0x50] sm:$0xff]  ;;  %v367_v34 = vld [vmem:[%s1495_s15 + $0x58] sm:$0xff]  ;;  %v361_v36 = vld [vmem:[%s1495_s15 + $0x28] sm:$0xff]  ;;  %v373_v39 = vpack.c.bf16 %v359_v32, %v358_v31 }
  0x3b   : > { %1168 = vmatpush3.bf16.msra.mxu0 %v1288_v18  ;;  %1206 = vmatpush3.bf16.msra.mxu1 %v1288_v18  ;;  %v368_v37 = vld [vmem:[%s1495_s15 + $0x60] sm:$0xff]  ;;  %v369_v38 = vld [vmem:[%s1495_s15 + $0x68] sm:$0xff]  ;;  %v377_v40 = vpack.c.bf16 %v367_v34, %v366_v33  ;;  %v374_v41 = vpack.c.bf16 %v361_v36, %v360_v35  ;;  %v362_v43 = vld [vmem:[%s1495_s15 + $0x30] sm:$0xff]  ;;  %v1376_v35 = vmov (!%p1096_p13), 0  }
  0x3c   : > { %1169 = vmatprep.subr.bf16.mxu0 %v1289_v19  ;;  %1199 = vmatprep.subr.bf16.mxu1 %v1289_v19  ;;  %v378_v42 = vpack.c.bf16 %v369_v38, %v368_v37  ;;  %v363_v44 = vld [vmem:[%s1495_s15 + $0x38] sm:$0xff]  ;;  %v370_v45 = vld [vmem:[%s1495_s15 + $0x70] sm:$0xff]  ;;  %v380_v51 = vld [vmem:[#allocation2] sm:$0xff] }
  0x3d   : > { %v371_v46 = vld [vmem:[%s1495_s15 + $0x78] sm:$0xff]  ;;  %v375_v47 = vpack.c.bf16 %v363_v44, %v362_v43  ;;  %v382_v49 = vld [vmem:[#allocation2 + $0x10] sm:$0xff]  ;;  %v388_v52 = vld [vmem:[#allocation2 + $0x40] sm:$0xff] }
  0x3e   : > { %v379_v48 = vpack.c.bf16 %v371_v46, %v370_v45  ;;  %v390_v50 = vld [vmem:[#allocation2 + $0x50] sm:$0xff]  ;;  %v383_v55 = vld [vmem:[#allocation2 + $0x18] sm:$0xff]  ;;  %v381_v61 = vld [vmem:[#allocation2 + $0x8] sm:$0xff] }
  0x3f   : > { %1170 = vmatpush3.bf16.msra.mxu0 %v1289_v19  ;;  %1207 = vmatpush3.bf16.msra.mxu1 %v1289_v19  ;;  %v391_v56 = vld [vmem:[#allocation2 + $0x58] sm:$0xff]  ;;  %v389_v62 = vld [vmem:[#allocation2 + $0x48] sm:$0xff]  ;;  %v386_v9 = vld [vmem:[#allocation2 + $0x30] sm:$0xff] }
  0x40   : > { %1171 = vmatprep.subr.bf16.mxu0 %v1290_v20  ;;  %1200 = vmatprep.subr.bf16.mxu1 %v1290_v20  ;;  %v394_v10 = vld [vmem:[#allocation2 + $0x70] sm:$0xff]  ;;  %v384_v11 = vld [vmem:[#allocation2 + $0x20] sm:$0xff]  ;;  %v387_v15 = vld [vmem:[#allocation2 + $0x38] sm:$0xff] }
  0x41   : > { %v392_v12 = vld [vmem:[#allocation2 + $0x60] sm:$0xff]  ;;  %v395_v16 = vld [vmem:[#allocation2 + $0x78] sm:$0xff]  ;;  %v385_v21 = vld [vmem:[#allocation2 + $0x28] sm:$0xff] }
  0x42   : > { %v393_v22 = vld [vmem:[#allocation2 + $0x68] sm:$0xff]  ;;  %v1298_v36 = vld [vmem:[%s1657_s2 + $0x14] ss:$8 sps:$4 sm:$0xff] (!%p1096_p13)   ;;  %v1300_v37 = vld [vmem:[%s1657_s2 + $0x10] ss:$8 sps:$4 sm:$0xff] (!%p1096_p13)  }
  0x43   : > { %1172 = vmatpush3.bf16.msra.mxu0 %v1290_v20  ;;  %1208 = vmatpush3.bf16.msra.mxu1 %v1290_v20  ;;  %v1295_v33 = vld [vmem:[%s1657_s2 + $0x4] ss:$8 sps:$4 sm:$0xff] (!%p1096_p13)   ;;  %v1297_v34 = vld [vmem:[%s1657_s2] ss:$8 sps:$4 sm:$0xff] (!%p1096_p13)   ;;  %v1310_v44 = vld [vmem:[%s1657_s2 + $0x54] ss:$8 sps:$4 sm:$0xff] (!%p1096_p13)  }
  0x44   : > { %1173 = vmatprep.subr.bf16.mxu0 %v1291_v27  ;;  %1201 = vmatprep.subr.bf16.mxu1 %v1291_v27  ;;  %v1301_v38 = vld [vmem:[%s1657_s2 + $0x24] ss:$8 sps:$4 sm:$0xff] (!%p1096_p13)   ;;  %v1309_v43 = vld [vmem:[%s1657_s2 + $0x40] ss:$8 sps:$4 sm:$0xff] (!%p1096_p13)   ;;  %v1312_v45 = vld [vmem:[%s1657_s2 + $0x50] ss:$8 sps:$4 sm:$0xff] (!%p1096_p13)  }
  0x45   : > { %v1313_v46 = vld [vmem:[%s1657_s2 + $0x64] ss:$8 sps:$4 sm:$0xff] (!%p1096_p13)  }
  0x47   : > { %1174 = vmatpush3.bf16.msra.mxu0 %v1291_v27  ;;  %1209 = vmatpush3.bf16.msra.mxu1 %v1291_v27 }
  0x48   : > { %1175 = vmatprep.subr.bf16.mxu0 %v1292_v28  ;;  %1202 = vmatprep.subr.bf16.mxu1 %v1292_v28 }
  0x4b   : > { %1176 = vmatpush3.bf16.msra.mxu0 %v1292_v28  ;;  %1210 = vmatpush3.bf16.msra.mxu1 %v1292_v28 }
  0x4c   : > { %1177 = vmatprep.subr.bf16.mxu0 %v1293_v29  ;;  %1203 = vmatprep.subr.bf16.mxu1 %v1293_v29 }
  0x4f   : > { %1178 = vmatpush3.bf16.msra.mxu0 %v1293_v29  ;;  %1211 = vmatpush3.bf16.msra.mxu1 %v1293_v29 }
  0x50   : > { %1179 = vmatprep.subr.bf16.mxu0 %v1294_v30  ;;  %1204 = vmatprep.subr.bf16.mxu1 %v1294_v30 }
  0x53   : > { %1180 = vmatpush3.bf16.msra.mxu0 %v1294_v30  ;;  %1212 = vmatpush3.bf16.msra.mxu1 %v1294_v30 }
  0x54   : > { %725 = vmatprep.subr.bf16.mxu0 (!%p1096_p13), %v1295_v33  ;;  %1213 = vmatprep.subr.bf16.mxu1 (!%p1096_p13), %v1295_v33 }
  0x56   : > { %1182 = vmatmul.mubr.bf16.vlgmr.msra.gmra.mrb[0].mxu0 %v373_v39  ;;  %1190 = vmatmul.mubr.bf16.vlgmr.msra.gmra.mrb[0].mxu1 %v377_v40  ;;  %v1303_v39 = vld [vmem:[%s1657_s2 + $0x20] ss:$8 sps:$4 sm:$0xff] (!%p1096_p13)   ;;  %v1304_v40 = vld [vmem:[%s1657_s2 + $0x34] ss:$8 sps:$4 sm:$0xff] (!%p1096_p13)  }
  0x57   : > { %1185 = vmatprep.mubr.bf16.mxu0 %v374_v41  ;;  %1193 = vmatprep.mubr.bf16.mxu1 %v378_v42  ;;  %v1306_v41 = vld [vmem:[%s1657_s2 + $0x30] ss:$8 sps:$4 sm:$0xff] (!%p1096_p13)   ;;  %v1307_v42 = vld [vmem:[%s1657_s2 + $0x44] ss:$8 sps:$4 sm:$0xff] (!%p1096_p13)  }
  0x58   : > { %726 = vmatpush1.bf16.msra.mxu0 (!%p1096_p13), %v1297_v34  ;;  %1221 = vmatpush1.bf16.msra.mxu1 (!%p1096_p13), %v1297_v34 }
  0x59   : > { %727 = vmatprep.subr.bf16.mxu0 (!%p1096_p13), %v1298_v36  ;;  %1214 = vmatprep.subr.bf16.mxu1 (!%p1096_p13), %v1298_v36 }
  0x5c   : > { %728 = vmatpush1.bf16.msra.mxu0 (!%p1096_p13), %v1300_v37  ;;  %1222 = vmatpush1.bf16.msra.mxu1 (!%p1096_p13), %v1300_v37 }
  0x5d   : > { %729 = vmatprep.subr.bf16.mxu0 (!%p1096_p13), %v1301_v38  ;;  %1215 = vmatprep.subr.bf16.mxu1 (!%p1096_p13), %v1301_v38 }
  0x5e   : > { %1186 = vmatmul.mubr.bf16.gmra.mrb[4].mxu0 %v375_v47  ;;  %1194 = vmatmul.mubr.bf16.gmra.mrb[4].mxu1 %v379_v48  ;;  %v1315_v47 = vld [vmem:[%s1657_s2 + $0x60] ss:$8 sps:$4 sm:$0xff] (!%p1096_p13)   ;;  %v1316_v48 = vld [vmem:[%s1657_s2 + $0x74] ss:$8 sps:$4 sm:$0xff] (!%p1096_p13)  }
  0x5f   : > { %757 = vmatprep.mubr.bf16.mxu0 (!%p1096_p13), %v1376_v35  ;;  %797 = vmatprep.mubr.bf16.mxu1 (!%p1096_p13), %v1376_v35 }
  0x60   : > { %730 = vmatpush1.bf16.msra.mxu0 (!%p1096_p13), %v1303_v39  ;;  %1223 = vmatpush1.bf16.msra.mxu1 (!%p1096_p13), %v1303_v39 }
  0x61   : > { %731 = vmatprep.subr.bf16.mxu0 (!%p1096_p13), %v1304_v40  ;;  %1216 = vmatprep.subr.bf16.mxu1 (!%p1096_p13), %v1304_v40 }
  0x64   : > { %732 = vmatpush1.bf16.msra.mxu0 (!%p1096_p13), %v1306_v41  ;;  %1224 = vmatpush1.bf16.msra.mxu1 (!%p1096_p13), %v1306_v41 }
  0x65   : > { %733 = vmatprep.subr.bf16.mxu0 (!%p1096_p13), %v1307_v42  ;;  %1217 = vmatprep.subr.bf16.mxu1 (!%p1096_p13), %v1307_v42 }
  0x68   : > { %734 = vmatpush1.bf16.msra.mxu0 (!%p1096_p13), %v1309_v43  ;;  %1225 = vmatpush1.bf16.msra.mxu1 (!%p1096_p13), %v1309_v43 }
  0x69   : > { %735 = vmatprep.subr.bf16.mxu0 (!%p1096_p13), %v1310_v44  ;;  %1218 = vmatprep.subr.bf16.mxu1 (!%p1096_p13), %v1310_v44 }
  0x6c   : > { %736 = vmatpush1.bf16.msra.mxu0 (!%p1096_p13), %v1312_v45  ;;  %1226 = vmatpush1.bf16.msra.mxu1 (!%p1096_p13), %v1312_v45 }
  0x6d   : > { %737 = vmatprep.subr.bf16.mxu0 (!%p1096_p13), %v1313_v46  ;;  %1219 = vmatprep.subr.bf16.mxu1 (!%p1096_p13), %v1313_v46 }
  0x70   : > { %738 = vmatpush1.bf16.msra.mxu0 (!%p1096_p13), %v1315_v47  ;;  %1227 = vmatpush1.bf16.msra.mxu1 (!%p1096_p13), %v1315_v47 }
  0x71   : > { %739 = vmatprep.subr.bf16.mxu0 (!%p1096_p13), %v1316_v48  ;;  %1220 = vmatprep.subr.bf16.mxu1 (!%p1096_p13), %v1316_v48 }
 0x129   : > { %v1183_v53 = vpop.f32.mrb[0].mxu0  ;;  %v1191_v54 = vpop.f32.mrb[0].mxu1 }
 0x12a   : > { %v559_v57 = vadd.f32 %v1183_v53, %v382_v49  ;;  %v567_v58 = vadd.f32 %v1191_v54, %v390_v50  ;;  %v494_v59 = vpop.f32.mrb[1].mxu0  ;;  %v526_v60 = vpop.f32.mrb[1].mxu1  ;;  %v1318_v49 = vld [vmem:[%s1657_s2 + $0x70] ss:$8 sps:$4 sm:$0xff] (!%p1096_p13)  }
 0x12b   : > { %v557_v63 = vadd.f32 %v494_v59, %v380_v51  ;;  %v565_v0 = vadd.f32 %v526_v60, %v388_v52  ;;  %v1184_v1 = vpop.f32.mrb[2].mxu0  ;;  %v1192_v2 = vpop.f32.mrb[2].mxu1  ;;  %740 = vmatpush1.bf16.msra.mxu0 (!%p1096_p13), %v1318_v49  ;;  %1228 = vmatpush1.bf16.msra.mxu1 (!%p1096_p13), %v1318_v49 }
 0x12c   : > { %575 = vst [vmem:[#allocation2 + $0x10] sm:$0xff] %v559_v57  ;;  %583 = vst [vmem:[#allocation2 + $0x50] sm:$0xff] %v567_v58  ;;  %v560_v3 = vadd.f32 %v1184_v1, %v383_v55  ;;  %v568_v4 = vadd.f32 %v1192_v2, %v391_v56  ;;  %v497_v5 = vpop.f32.mrb[3].mxu0  ;;  %v529_v6 = vpop.f32.mrb[3].mxu1 }
 0x12d   : > { %573 = vst [vmem:[#allocation2] sm:$0xff] %v557_v63  ;;  %581 = vst [vmem:[#allocation2 + $0x40] sm:$0xff] %v565_v0  ;;  %v558_v7 = vadd.f32 %v497_v5, %v381_v61  ;;  %v566_v8 = vadd.f32 %v529_v6, %v389_v62 }
 0x12e   : > { %576 = vst [vmem:[#allocation2 + $0x18] sm:$0xff] %v560_v3  ;;  %584 = vst [vmem:[#allocation2 + $0x58] sm:$0xff] %v568_v4 }
 0x12f   : > { %574 = vst [vmem:[#allocation2 + $0x8] sm:$0xff] %v558_v7  ;;  %582 = vst [vmem:[#allocation2 + $0x48] sm:$0xff] %v566_v8 }
 0x131   : > { %v1187_v13 = vpop.f32.mrb[4].mxu0  ;;  %v1195_v14 = vpop.f32.mrb[4].mxu1  ;;  %592 = sbr.rel (%p1096_p13) target bundleno = 560 (0x230), region = 82 }
 0x132   : > { %v563_v17 = vadd.f32 %v1187_v13, %v386_v9  ;;  %v571_v18 = vadd.f32 %v1195_v14, %v394_v10  ;;  %v510_v19 = vpop.f32.mrb[5].mxu0  ;;  %v542_v20 = vpop.f32.mrb[5].mxu1  ;;  %v635_v10 = vlaneseq (!%p1096_p13)  ;;  %v633_v13 = vld [vmem:[%s1658_s3] sm:$0x3] (!%p1096_p13) }
 0x133   : > { %v561_v23 = vadd.f32 %v510_v19, %v384_v11  ;;  %v569_v24 = vadd.f32 %v542_v20, %v392_v12  ;;  %v1188_v25 = vpop.f32.mrb[6].mxu0  ;;  %v1196_v26 = vpop.f32.mrb[6].mxu1  ;;  %v595_v56 = vld [vmem:[#allocation2 + $0x10] sm:$0xff] (!%p1096_p13) }
 0x134   : > { %579 = vst [vmem:[#allocation2 + $0x30] sm:$0xff] %v563_v17  ;;  %587 = vst [vmem:[#allocation2 + $0x70] sm:$0xff] %v571_v18  ;;  %v564_v27 = vadd.f32 %v1188_v25, %v387_v15  ;;  %v572_v28 = vadd.f32 %v1196_v26, %v395_v16  ;;  %v513_v29 = vpop.f32.mrb[7].mxu0  ;;  %v545_v30 = vpop.f32.mrb[7].mxu1  ;;  %v593_v50 = vld [vmem:[#allocation2] sm:$0xff] (!%p1096_p13)  ;;  %v603_v58 = vld [vmem:[#allocation2 + $0x50] sm:$0xff] (!%p1096_p13) }
 0x135   : > { %577 = vst [vmem:[#allocation2 + $0x20] sm:$0xff] %v561_v23  ;;  %585 = vst [vmem:[#allocation2 + $0x60] sm:$0xff] %v569_v24  ;;  %v562_v31 = vadd.f32 %v513_v29, %v385_v21  ;;  %v570_v32 = vadd.f32 %v545_v30, %v393_v22  ;;  %v601_v52 = vld [vmem:[#allocation2 + $0x40] sm:$0xff] (!%p1096_p13)  ;;  %v596_v57 = vld [vmem:[#allocation2 + $0x18] sm:$0xff] (!%p1096_p13)  ;;  %v636_v11 = vshrl.u32 (!%p1096_p13), %v635_v10, 7 }
 0x136   : > { %580 = vst [vmem:[#allocation2 + $0x38] sm:$0xff] %v564_v27  ;;  %588 = vst [vmem:[#allocation2 + $0x78] sm:$0xff] %v572_v28  ;;  %v594_v51 = vld [vmem:[#allocation2 + $0x8] sm:$0xff] (!%p1096_p13)  ;;  %v604_v59 = vld [vmem:[#allocation2 + $0x58] sm:$0xff] (!%p1096_p13)  ;;  %v610_v60 = vpack.c.bf16 (!%p1096_p13), %v596_v57, %v595_v56 }
 0x137   : > { %578 = vst [vmem:[#allocation2 + $0x28] sm:$0xff] %v562_v31  ;;  %586 = vst [vmem:[#allocation2 + $0x68] sm:$0xff] %v570_v32  ;;  %v602_v53 = vld [vmem:[#allocation2 + $0x48] sm:$0xff] (!%p1096_p13)  ;;  %v609_v54 = vpack.c.bf16 (!%p1096_p13), %v594_v51, %v593_v50  ;;  %v614_v61 = vpack.c.bf16 (!%p1096_p13), %v604_v59, %v603_v58  ;;  %v637_v12 = vsub.s32 (!%p1096_p13), 0, %v636_v11  ;;  %v641_v14 = vsub.s32 (!%p1096_p13), 1, %v636_v11 }
 0x138   : > { %v613_v55 = vpack.c.bf16 %v602_v53, %v601_v52 }
 0x139   : > { %758 = vmatmul.mubr.bf16.vlgmr.msra.gmra.mrb[0].mxu0 %v609_v54  ;;  %v1582_v15 = vrot.slane %v633_v13, %v637_v12  ;;  %v1584_v16 = vrot.slane %v633_v13, %v641_v14 }
 0x13a   : > { %798 = vmatmul.mubr.bf16.vlgmr.msra.gmra.mrb[0].mxu1 %v613_v55  ;;  %767 = vmatprep.mubr.bf16.mxu0 %v1376_v35 }
 0x13b   : > { %807 = vmatprep.mubr.bf16.mxu1 %v1376_v35  ;;  %v599_v4 = vld [vmem:[#allocation2 + $0x30] sm:$0xff] }
 0x13c   : > { %v597_v62 = vld [vmem:[#allocation2 + $0x20] sm:$0xff]  ;;  %v607_v6 = vld [vmem:[#allocation2 + $0x70] sm:$0xff] }
 0x13d   : > { %v605_v0 = vld [vmem:[#allocation2 + $0x60] sm:$0xff]  ;;  %v600_v5 = vld [vmem:[#allocation2 + $0x38] sm:$0xff] }
 0x13e   : > { %v598_v63 = vld [vmem:[#allocation2 + $0x28] sm:$0xff]  ;;  %v608_v7 = vld [vmem:[#allocation2 + $0x78] sm:$0xff]  ;;  %v612_v8 = vpack.c.bf16 %v600_v5, %v599_v4 }
 0x13f   : > { %v606_v1 = vld [vmem:[#allocation2 + $0x68] sm:$0xff]  ;;  %v611_v2 = vpack.c.bf16 %v598_v63, %v597_v62  ;;  %v616_v9 = vpack.c.bf16 %v608_v7, %v607_v6 }
 0x140   : > { %v615_v3 = vpack.c.bf16 %v606_v1, %v605_v0 }
 0x141   : > { %768 = vmatmul.mubr.bf16.gmra.mrb[4].mxu0 %v610_v60 }
 0x142   : > { %808 = vmatmul.mubr.bf16.gmra.mrb[4].mxu1 %v614_v61  ;;  %777 = vmatprep.mubr.bf16.mxu0 %v1376_v35 }
 0x143   : > { %817 = vmatprep.mubr.bf16.mxu1 %v1376_v35 }
 0x149   : > { %778 = vmatmul.mubr.bf16.gmra.mrb[8].mxu0 %v611_v2 }
 0x14a   : > { %818 = vmatmul.mubr.bf16.gmra.mrb[8].mxu1 %v615_v3  ;;  %787 = vmatprep.mubr.bf16.mxu0 %v1376_v35 }
 0x14b   : > { %827 = vmatprep.mubr.bf16.mxu1 %v1376_v35 }
 0x151   : > { %788 = vmatmul.mubr.bf16.gmra.mrb[12].mxu0 %v612_v8 }
 0x152   : > { %828 = vmatmul.mubr.bf16.gmra.mrb[12].mxu1 %v616_v9 }
 0x20c   : > { %v759_v17 = vpop.f32.mrb[0].mxu0 }
 0x20d   : > { %v799_v18 = vpop.f32.mrb[0].mxu1  ;;  %v760_v19 = vadd.f32 %v759_v17, %v1582_v15  ;;  %v761_v21 = vpop.f32.mrb[1].mxu0 }
 0x20e   : > { %v800_v20 = vadd.f32 %v799_v18, %v1582_v15  ;;  %v801_v22 = vpop.f32.mrb[1].mxu1  ;;  %v762_v23 = vadd.f32 %v761_v21, %v1584_v16  ;;  %v763_v25 = vpop.f32.mrb[2].mxu0 }
 0x20f   : > { %v802_v24 = vadd.f32 %v801_v22, %v1584_v16  ;;  %v803_v26 = vpop.f32.mrb[2].mxu1  ;;  %v838_v27 = vmax.f32 %v760_v19, 0.0  ;;  %v764_v29 = vadd.f32 %v763_v25, %v1582_v15  ;;  %v765_v31 = vpop.f32.mrb[3].mxu0 }
 0x210   : > { %v854_v28 = vmax.f32 %v800_v20, 0.0  ;;  %v804_v30 = vadd.f32 %v803_v26, %v1582_v15  ;;  %v805_v32 = vpop.f32.mrb[3].mxu1  ;;  %v839_v33 = vmax.f32 %v762_v23, 0.0  ;;  %v766_v35 = vadd.f32 %v765_v31, %v1584_v16 }
 0x211   : > { %v855_v34 = vmax.f32 %v802_v24, 0.0  ;;  %v806_v36 = vadd.f32 %v805_v32, %v1584_v16  ;;  %v840_v37 = vmax.f32 %v764_v29, 0.0 }
 0x212   : > { %v856_v38 = vmax.f32 %v804_v30, 0.0  ;;  %v1133_v39 = vpack.c.bf16 %v839_v33, %v838_v27  ;;  %v841_v41 = vmax.f32 %v766_v35, 0.0 }
 0x213   : > { %v1141_v40 = vpack.c.bf16 %v855_v34, %v854_v28  ;;  %v857_v42 = vmax.f32 %v806_v36, 0.0 }
 0x214   : > { %966 = vst [vmem:[%s1493_s7] sm:$0xff] %v1133_v39  ;;  %v1134_v43 = vpack.c.bf16 %v841_v41, %v840_v37  ;;  %v769_v45 = vpop.f32.mrb[4].mxu0 }
 0x215   : > { %974 = vst [vmem:[%s1493_s7 + $0x40] sm:$0xff] %v1141_v40  ;;  %v1142_v44 = vpack.c.bf16 %v857_v42, %v856_v38  ;;  %v809_v46 = vpop.f32.mrb[4].mxu1  ;;  %v770_v47 = vadd.f32 %v769_v45, %v1582_v15  ;;  %v771_v49 = vpop.f32.mrb[5].mxu0 }
 0x216   : > { %v810_v48 = vadd.f32 %v809_v46, %v1582_v15  ;;  %v811_v50 = vpop.f32.mrb[5].mxu1  ;;  %967 = vst [vmem:[%s1493_s7 + $0x8] sm:$0xff] %v1134_v43  ;;  %v772_v51 = vadd.f32 %v771_v49, %v1584_v16  ;;  %v773_v53 = vpop.f32.mrb[6].mxu0 }
 0x217   : > { %975 = vst [vmem:[%s1493_s7 + $0x48] sm:$0xff] %v1142_v44  ;;  %v812_v52 = vadd.f32 %v811_v50, %v1584_v16  ;;  %v813_v54 = vpop.f32.mrb[6].mxu1  ;;  %v842_v55 = vmax.f32 %v770_v47, 0.0  ;;  %v774_v57 = vadd.f32 %v773_v53, %v1582_v15  ;;  %v775_v59 = vpop.f32.mrb[7].mxu0 }
 0x218   : > { %v858_v56 = vmax.f32 %v810_v48, 0.0  ;;  %v814_v58 = vadd.f32 %v813_v54, %v1582_v15  ;;  %v815_v60 = vpop.f32.mrb[7].mxu1  ;;  %v843_v61 = vmax.f32 %v772_v51, 0.0  ;;  %v776_v63 = vadd.f32 %v775_v59, %v1584_v16 }
 0x219   : > { %v859_v62 = vmax.f32 %v812_v52, 0.0  ;;  %v816_v0 = vadd.f32 %v815_v60, %v1584_v16  ;;  %v844_v1 = vmax.f32 %v774_v57, 0.0 }
 0x21a   : > { %v860_v2 = vmax.f32 %v814_v58, 0.0  ;;  %v1135_v3 = vpack.c.bf16 %v843_v61, %v842_v55  ;;  %v845_v5 = vmax.f32 %v776_v63, 0.0 }
 0x21b   : > { %v1143_v4 = vpack.c.bf16 %v859_v62, %v858_v56  ;;  %v861_v6 = vmax.f32 %v816_v0, 0.0 }
 0x21c   : > { %968 = vst [vmem:[%s1493_s7 + $0x10] sm:$0xff] %v1135_v3  ;;  %v1136_v7 = vpack.c.bf16 %v845_v5, %v844_v1  ;;  %v779_v9 = vpop.f32.mrb[8].mxu0 }
 0x21d   : > { %976 = vst [vmem:[%s1493_s7 + $0x50] sm:$0xff] %v1143_v4  ;;  %v1144_v8 = vpack.c.bf16 %v861_v6, %v860_v2  ;;  %v819_v10 = vpop.f32.mrb[8].mxu1  ;;  %v780_v11 = vadd.f32 %v779_v9, %v1582_v15  ;;  %v781_v13 = vpop.f32.mrb[9].mxu0 }
 0x21e   : > { %v820_v12 = vadd.f32 %v819_v10, %v1582_v15  ;;  %v821_v14 = vpop.f32.mrb[9].mxu1  ;;  %969 = vst [vmem:[%s1493_s7 + $0x18] sm:$0xff] %v1136_v7  ;;  %v782_v17 = vadd.f32 %v781_v13, %v1584_v16  ;;  %v783_v19 = vpop.f32.mrb[10].mxu0 }
 0x21f   : > { %977 = vst [vmem:[%s1493_s7 + $0x58] sm:$0xff] %v1144_v8  ;;  %v822_v18 = vadd.f32 %v821_v14, %v1584_v16  ;;  %v823_v20 = vpop.f32.mrb[10].mxu1  ;;  %v846_v21 = vmax.f32 %v780_v11, 0.0  ;;  %v784_v23 = vadd.f32 %v783_v19, %v1582_v15  ;;  %v785_v25 = vpop.f32.mrb[11].mxu0 }
 0x220   : > { %v862_v22 = vmax.f32 %v820_v12, 0.0  ;;  %v824_v24 = vadd.f32 %v823_v20, %v1582_v15  ;;  %v825_v26 = vpop.f32.mrb[11].mxu1  ;;  %v847_v27 = vmax.f32 %v782_v17, 0.0  ;;  %v786_v29 = vadd.f32 %v785_v25, %v1584_v16 }
 0x221   : > { %v863_v28 = vmax.f32 %v822_v18, 0.0  ;;  %v826_v30 = vadd.f32 %v825_v26, %v1584_v16  ;;  %v848_v31 = vmax.f32 %v784_v23, 0.0 }
 0x222   : > { %v864_v32 = vmax.f32 %v824_v24, 0.0  ;;  %v1137_v33 = vpack.c.bf16 %v847_v27, %v846_v21  ;;  %v849_v35 = vmax.f32 %v786_v29, 0.0 }
 0x223   : > { %v1145_v34 = vpack.c.bf16 %v863_v28, %v862_v22  ;;  %v865_v36 = vmax.f32 %v826_v30, 0.0 }
 0x224   : > { %970 = vst [vmem:[%s1493_s7 + $0x20] sm:$0xff] %v1137_v33  ;;  %v1138_v37 = vpack.c.bf16 %v849_v35, %v848_v31  ;;  %v789_v39 = vpop.f32.mrb[12].mxu0 }
 0x225   : > { %978 = vst [vmem:[%s1493_s7 + $0x60] sm:$0xff] %v1145_v34  ;;  %v1146_v38 = vpack.c.bf16 %v865_v36, %v864_v32  ;;  %v829_v40 = vpop.f32.mrb[12].mxu1  ;;  %v790_v41 = vadd.f32 %v789_v39, %v1582_v15  ;;  %v791_v43 = vpop.f32.mrb[13].mxu0 }
 0x226   : > { %v830_v42 = vadd.f32 %v829_v40, %v1582_v15  ;;  %v831_v44 = vpop.f32.mrb[13].mxu1  ;;  %971 = vst [vmem:[%s1493_s7 + $0x28] sm:$0xff] %v1138_v37  ;;  %v792_v45 = vadd.f32 %v791_v43, %v1584_v16  ;;  %v793_v47 = vpop.f32.mrb[14].mxu0 }
 0x227   : > { %979 = vst [vmem:[%s1493_s7 + $0x68] sm:$0xff] %v1146_v38  ;;  %v832_v46 = vadd.f32 %v831_v44, %v1584_v16  ;;  %v833_v48 = vpop.f32.mrb[14].mxu1  ;;  %v850_v49 = vmax.f32 %v790_v41, 0.0  ;;  %v794_v51 = vadd.f32 %v793_v47, %v1582_v15  ;;  %v795_v53 = vpop.f32.mrb[15].mxu0 }
 0x228   : > { %v866_v50 = vmax.f32 %v830_v42, 0.0  ;;  %v834_v52 = vadd.f32 %v833_v48, %v1582_v15  ;;  %v835_v54 = vpop.f32.mrb[15].mxu1  ;;  %v851_v55 = vmax.f32 %v792_v45, 0.0  ;;  %v796_v57 = vadd.f32 %v795_v53, %v1584_v16 }
 0x229   : > { %v867_v56 = vmax.f32 %v832_v46, 0.0  ;;  %v836_v58 = vadd.f32 %v835_v54, %v1584_v16  ;;  %v852_v59 = vmax.f32 %v794_v51, 0.0 }
 0x22a   : > { %v868_v60 = vmax.f32 %v834_v52, 0.0  ;;  %v1139_v61 = vpack.c.bf16 %v851_v55, %v850_v49  ;;  %v853_v63 = vmax.f32 %v796_v57, 0.0 }
 0x22b   : > { %v1147_v62 = vpack.c.bf16 %v867_v56, %v866_v50  ;;  %v869_v0 = vmax.f32 %v836_v58, 0.0 }
 0x22c   : > { %972 = vst [vmem:[%s1493_s7 + $0x30] sm:$0xff] %v1139_v61  ;;  %v1140_v1 = vpack.c.bf16 %v853_v63, %v852_v59 }
 0x22d   : > { %980 = vst [vmem:[%s1493_s7 + $0x70] sm:$0xff] %v1147_v62  ;;  %v1148_v15 = vpack.c.bf16 %v869_v0, %v868_v60 }
 0x22e   : > { %973 = vst [vmem:[%s1493_s7 + $0x38] sm:$0xff] %v1140_v1 }
 0x22f   : > { %981 = vst [vmem:[%s1493_s7 + $0x78] sm:$0xff] %v1148_v15 }
 0x230 PF: > { %s14_s21 = sadd.s32 1, %s1373_s21   ;;  %s1660_s15 = smov %s1353_s16 }
 0x231   : > { %p11_p0 = scmp.ge.s32.totalorder %s14_s21, 6   ;;  %s1661_s16 = smov %s1453_s28 }
 0x232   : > { %s1662_s17 = smov %s1365_s19  ;;  %s1663_s18 = smov %s1369_s20 }
 0x233   : > { %s1664_s19 = smov %s1667_s22  ;;  %s1665_s20 = smov %s1671_s23 }
 0x234   :  { %13 = sbr.rel (!%p11_p0) target bundleno = 4 (0x4), region = 120 }

// kernel: gnn_forward.3
= control target key start
LH: loop header
LB: loop body
LE: loop exit
PB: predicated region body
PF: predicated region fallthrough
CT: control target
= control target key end

     0   :  { %s1347_s15 = smov 0   ;;  %s1349_s16 = smov 0   ;;  %s1564_s0 = inlined_call_operand.vmem [shape: f32[256,256], index: 0, kind: input, shape index: {}]   ;;  %s1565_s1 = inlined_call_operand.vmem [shape: bf16[256,256], index: 1, kind: input, shape index: {}]   ;;  %s1566_s2 = inlined_call_operand.vmem [shape: bf16[256,128], index: 2, kind: input, shape index: {}]   ;;  %s1567_s3 = inlined_call_operand.vmem [shape: f32[1,128], index: 3, kind: input, shape index: {}]   ;;  %s1568_s4 = inlined_call_operand.vmem [shape: f32[256,128], index: 4, kind: output, shape index: {}]  }
   0x1   :  { %s1351_s17 = smov 0   ;;  %s1353_s18 = smov 0  }
   0x2   :  { %s1355_s19 = smov 0   ;;  %s1357_s20 = smov 0  }
   0x3   :  { %s1359_s21 = smov 0  }
   0x4 LB: > { %s23_s22 = sadd.s32 1, %s1311_s19  ;;  %s26_s23 = sadd.s32 1, %s1315_s20  ;;  %s1319_s21 = sphi %s1359_s21, %s14_s21   ;;  %s1315_s20 = sphi %s1357_s20, %s1574_s20   ;;  %s1311_s19 = sphi %s1355_s19, %s1573_s19   ;;  %s1307_s18 = sphi %s1353_s18, %s1572_s18   ;;  %s1303_s17 = sphi %s1351_s17, %s1571_s17   ;;  %s1299_s16 = sphi %s1349_s16, %s1570_s16   ;;  %s1295_s15 = sphi %s1347_s15, %s1569_s15  }
   0x5   : > { %p24_p0 = scmp.ge.s32.totalorder %s23_s22, 2  ;;  %p42_p1 = scmp.ne.s32.totalorder %s1299_s16, %s1295_s15 }
   0x6   : > { %p43_p2 = scmp.eq.s32.totalorder %s1319_s21, 0  ;;  %s35_s27 = sadd.s32 1, %s1299_s16 }
   0x7   : > { %s1576_s22 = smov (%p24_p0, %s23_s22), 0  ;;  %s1578_s23 = smov (!%p24_p0, %s26_s23), %s1315_s20 }
   0x8   : > { %p44_p3 = por %p43_p2, %p42_p1  ;;  %p28_p4 = scmp.ge.s32.totalorder %s1578_s23, 2 }
   0x9   : > { %s31_s24 = ssub.s32 %s1311_s19, %s1576_s22  ;;  %p1005_p6 = scmp.ge.s32.totalorder %s1319_s21, 4 }
   0xa   : > { %s1580_s23 = smov (%p28_p4, %s1578_s23), 0 }
   0xb   : > { %s30_s25 = ssub.s32 %s1315_s20, %s1580_s23  ;;  %168 = sbr.rel (%p1005_p6) target bundleno = 32 (0x20), region = 24 }
   0xc   : > { %s32_s26 = sor.u32 %s31_s24, %s30_s25 }
   0xd   : > { %p33_p5 = scmp.eq.s32.totalorder %s32_s26, 0 }
   0xf   : > { %s1398_s28 = scalar_select %p33_p5, %s1299_s16, %s35_s27  }
  0x12   : > { %171 = sbr.rel (!%p44_p3) target bundleno = 32 (0x20), region = 28  ;;  %s173_s29 = sand.u32 (%p44_p3), 1, %s1299_s16  }
  0x13   : > { %s1054_s30 = sshll.u32 (%p44_p3), %s1315_s20, 5  ;;  %s1006_s5 = sshll.u32 (%p44_p3), %s173_s29, 7 }
  0x14   : > { %s178_s6 = sadd.s32 (%p44_p3), %s1311_s19, %s1054_s30  ;;  %s175_s11 = scalar_lea.vmem (%p44_p3), [#allocation3], %s1006_s5 }
  0x15   : > { %s1009_s7 = sshll.u32 (%p44_p3), %s178_s6, 3 }
  0x16   : > { %s1407_s10 = scalar_lea.vmem (%p44_p3), %s1564_s0, %s1009_s7 }
  0x17   : > { %v238_v0 = vld [vmem:[%s1407_s10] sm:$0xff] (%p44_p3)  ;;  %v240_v1 = vld [vmem:[%s1407_s10 + $0x10] sm:$0xff] (%p44_p3) }
  0x18   : > { %v242_v2 = vld [vmem:[%s1407_s10 + $0x20] sm:$0xff] (%p44_p3)  ;;  %239 = vst [vmem:[%s175_s11] sm:$0xff] (%p44_p3), %v238_v0  ;;  %241 = vst [vmem:[%s175_s11 + $0x8] sm:$0xff] (%p44_p3), %v240_v1  ;;  %v244_v3 = vld [vmem:[%s1407_s10 + $0x30] sm:$0xff] (%p44_p3) }
  0x19   : > { %243 = vst [vmem:[%s175_s11 + $0x10] sm:$0xff] %v242_v2  ;;  %v246_v4 = vld [vmem:[%s1407_s10 + $0x40] sm:$0xff]  ;;  %v248_v5 = vld [vmem:[%s1407_s10 + $0x50] sm:$0xff]  ;;  %245 = vst [vmem:[%s175_s11 + $0x18] sm:$0xff] %v244_v3 }
  0x1a   : > { %247 = vst [vmem:[%s175_s11 + $0x20] sm:$0xff] %v246_v4  ;;  %249 = vst [vmem:[%s175_s11 + $0x28] sm:$0xff] %v248_v5  ;;  %v250_v6 = vld [vmem:[%s1407_s10 + $0x60] sm:$0xff]  ;;  %v252_v7 = vld [vmem:[%s1407_s10 + $0x70] sm:$0xff] }
  0x1b   : > { %v254_v8 = vld [vmem:[%s1407_s10 + $0x80] sm:$0xff]  ;;  %251 = vst [vmem:[%s175_s11 + $0x30] sm:$0xff] %v250_v6  ;;  %253 = vst [vmem:[%s175_s11 + $0x38] sm:$0xff] %v252_v7  ;;  %v256_v9 = vld [vmem:[%s1407_s10 + $0x90] sm:$0xff] }
  0x1c   : > { %255 = vst [vmem:[%s175_s11 + $0x40] sm:$0xff] %v254_v8  ;;  %v258_v10 = vld [vmem:[%s1407_s10 + $0xa0] sm:$0xff]  ;;  %v260_v11 = vld [vmem:[%s1407_s10 + $0xb0] sm:$0xff]  ;;  %257 = vst [vmem:[%s175_s11 + $0x48] sm:$0xff] %v256_v9 }
  0x1d   : > { %259 = vst [vmem:[%s175_s11 + $0x50] sm:$0xff] %v258_v10  ;;  %261 = vst [vmem:[%s175_s11 + $0x58] sm:$0xff] %v260_v11  ;;  %v262_v12 = vld [vmem:[%s1407_s10 + $0xc0] sm:$0xff]  ;;  %v264_v13 = vld [vmem:[%s1407_s10 + $0xd0] sm:$0xff] }
  0x1e   : > { %v266_v14 = vld [vmem:[%s1407_s10 + $0xe0] sm:$0xff]  ;;  %263 = vst [vmem:[%s175_s11 + $0x60] sm:$0xff] %v262_v12  ;;  %265 = vst [vmem:[%s175_s11 + $0x68] sm:$0xff] %v264_v13  ;;  %v268_v15 = vld [vmem:[%s1407_s10 + $0xf0] sm:$0xff] }
  0x1f   : > { %267 = vst [vmem:[%s175_s11 + $0x70] sm:$0xff] %v266_v14  ;;  %269 = vst [vmem:[%s175_s11 + $0x78] sm:$0xff] %v268_v15 }
  0x20 PF: > { %p1010_p7 = scmp.ge.s32.totalorder %s1319_s21, 1  ;;  %p284_p8 = scmp.lt.s32.totalorder %s1319_s21, 5 }
  0x22   : > { %p285_p9 = pnand %p1010_p7, %p284_p8 }
  0x23   : > { %s291_s12 = sand.u32 (!%p285_p9), 1, %s1295_s15   ;;  %s1012_s13 = sshll.u32 (!%p285_p9), %s1303_s17, 4 }
  0x24   : > { %288 = sbr.rel (%p285_p9) target bundleno = 617 (0x269), region = 70  ;;  %s1011_s14 = sshll.u32 (!%p285_p9), %s291_s12, 7 }
  0x25   : > { %p324_p10 = scmp.lt.s32.totalorder (!%p285_p9), %s1012_s13, 31  ;;  %s1015_s24 = sshll.u32 (!%p285_p9), %s1307_s18, 4 }
  0x26   : > { %p331_p11 = scmp.lt.s32.totalorder (!%p285_p9), %s1015_s24, 31  ;;  %s1440_s15 = scalar_lea.vmem (!%p285_p9), [#allocation3], %s1011_s14 }
  0x27   : > { %p1017_p12 = scmp.ne.s32.totalorder (!%p285_p9), %s1303_s17, 0 }
  0x2b   : > { %s1582_s13 = smov (!%p324_p10, %s1012_s13), 31  ;;  %s1584_s24 = smov (!%p331_p11, %s1015_s24), 31 }
  0x2c   : > { %s1055_s25 = sshll.u32 %s1582_s13, 3  ;;  %s1016_s30 = sshll.u32 %s1584_s24, 3  ;;  %v1321_v16 = vmov (!%p1017_p12), 0.0  }
  0x2d   : > { %s1433_s29 = scalar_lea.vmem %s1565_s1, %s1055_s25  ;;  %s1438_s7 = scalar_lea.vmem %s1568_s4, %s1016_s30  ;;  %341 = vst [vmem:[#allocation2] sm:$0xff] (!%p1017_p12), %v1321_v16  ;;  %342 = vst [vmem:[#allocation2 + $0x8] sm:$0xff] (!%p1017_p12), %v1321_v16 }
  0x2e   : > { %340 = sbr.rel (%p1017_p12) target bundleno = 53 (0x35), region = 78  ;;  %343 = vst [vmem:[#allocation2 + $0x10] sm:$0xff] (!%p1017_p12), %v1321_v16  ;;  %344 = vst [vmem:[#allocation2 + $0x18] sm:$0xff] (!%p1017_p12), %v1321_v16 }
  0x2f   : > { %345 = vst [vmem:[#allocation2 + $0x20] sm:$0xff] (!%p1017_p12), %v1321_v16  ;;  %346 = vst [vmem:[#allocation2 + $0x28] sm:$0xff] (!%p1017_p12), %v1321_v16 }
  0x30   : > { %347 = vst [vmem:[#allocation2 + $0x30] sm:$0xff] (!%p1017_p12), %v1321_v16  ;;  %348 = vst [vmem:[#allocation2 + $0x38] sm:$0xff] (!%p1017_p12), %v1321_v16 }
  0x31   : > { %349 = vst [vmem:[#allocation2 + $0x40] sm:$0xff] (!%p1017_p12), %v1321_v16  ;;  %350 = vst [vmem:[#allocation2 + $0x48] sm:$0xff] (!%p1017_p12), %v1321_v16 }
  0x32   : > { %351 = vst [vmem:[#allocation2 + $0x50] sm:$0xff] (!%p1017_p12), %v1321_v16  ;;  %352 = vst [vmem:[#allocation2 + $0x58] sm:$0xff] (!%p1017_p12), %v1321_v16 }
  0x33   : > { %353 = vst [vmem:[#allocation2 + $0x60] sm:$0xff] (!%p1017_p12), %v1321_v16  ;;  %354 = vst [vmem:[#allocation2 + $0x68] sm:$0xff] (!%p1017_p12), %v1321_v16 }
  0x34   : > { %355 = vst [vmem:[#allocation2 + $0x70] sm:$0xff] (!%p1017_p12), %v1321_v16  ;;  %356 = vst [vmem:[#allocation2 + $0x78] sm:$0xff] (!%p1017_p12), %v1321_v16 }
  0x35 PF: > { %v1225_v17 = vld [vmem:[%s1566_s2 + $0x40] sm:$0xff]   ;;  %v1227_v19 = vld [vmem:[%s1566_s2 + $0x48] sm:$0xff]   ;;  %v1229_v21 = vld [vmem:[%s1566_s2 + $0x50] sm:$0xff]   ;;  %p1050_p13 = scmp.ne.s32.totalorder %s1303_s17, 1 }
  0x36   : > { %v1226_v18 = vld [vmem:[%s1566_s2] sm:$0xff]   ;;  %1056 = vmatprep.subr.bf16.mxu0 %v1225_v17  ;;  %v1228_v20 = vld [vmem:[%s1566_s2 + $0x8] sm:$0xff]   ;;  %v1230_v22 = vld [vmem:[%s1566_s2 + $0x10] sm:$0xff]  }
  0x37   : > { %1057 = vmatpush3.bf16.msra.mxu0 %v1226_v18  ;;  %v1231_v23 = vld [vmem:[%s1566_s2 + $0x58] sm:$0xff]   ;;  %v1233_v25 = vld [vmem:[%s1566_s2 + $0x60] sm:$0xff]   ;;  %v1235_v27 = vld [vmem:[%s1566_s2 + $0x68] sm:$0xff]  }
  0x38   : > { %1058 = vmatprep.subr.bf16.mxu0 %v1227_v19  ;;  %v1232_v24 = vld [vmem:[%s1566_s2 + $0x18] sm:$0xff]   ;;  %v1234_v26 = vld [vmem:[%s1566_s2 + $0x20] sm:$0xff]   ;;  %v1236_v29 = vld [vmem:[%s1566_s2 + $0x28] sm:$0xff]  }
  0x39   : > { %v1243_v28 = vld [vmem:[%s1433_s29 + $0x4] ss:$8 sps:$4 sm:$0xff]   ;;  %v1237_v30 = vld [vmem:[%s1566_s2 + $0x70] sm:$0xff]   ;;  %v1239_v32 = vld [vmem:[%s1566_s2 + $0x78] sm:$0xff]  }
  0x3a   : > { %637 = vmatprep.mubr.bf16.mxu0 %v1243_v28  ;;  %v1238_v31 = vld [vmem:[%s1566_s2 + $0x30] sm:$0xff]   ;;  %v1240_v33 = vld [vmem:[%s1566_s2 + $0x38] sm:$0xff]   ;;  %v1241_v34 = vld [vmem:[%s1433_s29] ss:$8 sps:$4 sm:$0xff]  }
  0x3b   : > { %1059 = vmatpush3.bf16.msra.mxu0 %v1228_v20  ;;  %v1244_v35 = vld [vmem:[%s1433_s29 + $0x14] ss:$8 sps:$4 sm:$0xff]   ;;  %v1246_v36 = vld [vmem:[%s1433_s29 + $0x10] ss:$8 sps:$4 sm:$0xff]   ;;  %v1247_v37 = vld [vmem:[%s1433_s29 + $0x24] ss:$8 sps:$4 sm:$0xff]  }
  0x3c   : > { %1060 = vmatprep.subr.bf16.mxu0 %v1229_v21  ;;  %v1249_v38 = vld [vmem:[%s1433_s29 + $0x20] ss:$8 sps:$4 sm:$0xff]   ;;  %v1250_v39 = vld [vmem:[%s1433_s29 + $0x34] ss:$8 sps:$4 sm:$0xff]   ;;  %v1252_v40 = vld [vmem:[%s1433_s29 + $0x30] ss:$8 sps:$4 sm:$0xff]  }
  0x3d   : > { %v1253_v41 = vld [vmem:[%s1433_s29 + $0x44] ss:$8 sps:$4 sm:$0xff]   ;;  %v1255_v42 = vld [vmem:[%s1433_s29 + $0x40] ss:$8 sps:$4 sm:$0xff]   ;;  %v1256_v43 = vld [vmem:[%s1433_s29 + $0x54] ss:$8 sps:$4 sm:$0xff]  }
  0x3e   : > { %v1258_v44 = vld [vmem:[%s1433_s29 + $0x50] ss:$8 sps:$4 sm:$0xff]   ;;  %v1259_v45 = vld [vmem:[%s1433_s29 + $0x64] ss:$8 sps:$4 sm:$0xff]   ;;  %v1261_v46 = vld [vmem:[%s1433_s29 + $0x60] ss:$8 sps:$4 sm:$0xff]  }
  0x3f   : > { %1061 = vmatpush3.bf16.msra.mxu0 %v1230_v22  ;;  %v1262_v47 = vld [vmem:[%s1433_s29 + $0x74] ss:$8 sps:$4 sm:$0xff]   ;;  %v1264_v48 = vld [vmem:[%s1433_s29 + $0x70] ss:$8 sps:$4 sm:$0xff]   ;;  %v357_v49 = vld [vmem:[%s1440_s15] sm:$0xff] }
  0x40   : > { %1062 = vmatprep.subr.bf16.mxu0 %v1231_v23  ;;  %v358_v50 = vld [vmem:[%s1440_s15 + $0x8] sm:$0xff] }
  0x41   : > { %v373_v51 = vpack.c.bf16 %v358_v50, %v357_v49  ;;  %v363_v50 = vld [vmem:[%s1440_s15 + $0x30] sm:$0xff] }
  0x43   : > { %1063 = vmatpush3.bf16.msra.mxu0 %v1232_v24  ;;  %1152 = vmatprep.mubr.bf16.mxu1 %v373_v51  ;;  %v364_v51 = vld [vmem:[%s1440_s15 + $0x38] sm:$0xff] }
  0x44   : > { %1064 = vmatprep.subr.bf16.mxu0 %v1233_v25 }
  0x47   : > { %1065 = vmatpush3.bf16.msra.mxu0 %v1234_v26 }
  0x48   : > { %1066 = vmatprep.subr.bf16.mxu0 %v1235_v27 }
  0x4b   : > { %1067 = vmatpush3.bf16.msra.mxu0 %v1236_v29 }
  0x4c   : > { %1068 = vmatprep.subr.bf16.mxu0 %v1237_v30 }
  0x4f   : > { %1069 = vmatpush3.bf16.msra.mxu0 %v1238_v31 }
  0x50   : > { %1070 = vmatprep.subr.bf16.mxu0 %v1239_v32 }
  0x53   : > { %1071 = vmatpush3.bf16.msra.mxu0 %v1240_v33 }
  0x56   : > { %638 = vmatmul.mubr.bf16.vlgmr.msra.gmra.mrb[0].mxu0 %v1241_v34 }
  0x57   : > { %645 = vmatprep.mubr.bf16.mxu0 %v1244_v35 }
  0x5e   : > { %646 = vmatmul.mubr.bf16.gmra.mrb[4].mxu0 %v1246_v36 }
  0x5f   : > { %653 = vmatprep.mubr.bf16.mxu0 %v1247_v37 }
  0x66   : > { %654 = vmatmul.mubr.bf16.gmra.mrb[8].mxu0 %v1249_v38 }
  0x67   : > { %661 = vmatprep.mubr.bf16.mxu0 %v1250_v39 }
  0x6e   : > { %662 = vmatmul.mubr.bf16.gmra.mrb[12].mxu0 %v1252_v40 }
  0x6f   : > { %669 = vmatprep.mubr.bf16.mxu0 %v1253_v41 }
  0x76   : > { %670 = vmatmul.mubr.bf16.gmra.mrb[16].mxu0 %v1255_v42 }
  0x77   : > { %677 = vmatprep.mubr.bf16.mxu0 %v1256_v43  ;;  %v359_v43 = vld [vmem:[%s1440_s15 + $0x10] sm:$0xff] }
  0x7e   : > { %678 = vmatmul.mubr.bf16.gmra.mrb[20].mxu0 %v1258_v44  ;;  %v360_v44 = vld [vmem:[%s1440_s15 + $0x18] sm:$0xff] }
  0x7f   : > { %685 = vmatprep.mubr.bf16.mxu0 %v1259_v45 }
  0x86   : > { %686 = vmatmul.mubr.bf16.gmra.mrb[24].mxu0 %v1261_v46  ;;  %v361_v46 = vld [vmem:[%s1440_s15 + $0x20] sm:$0xff] }
  0x87   : > { %693 = vmatprep.mubr.bf16.mxu0 %v1262_v47  ;;  %v362_v47 = vld [vmem:[%s1440_s15 + $0x28] sm:$0xff] }
  0x88   : > { %v375_v49 = vpack.c.bf16 %v362_v47, %v361_v46 }
  0x8e   : > { %694 = vmatmul.mubr.bf16.gmra.mrb[28].mxu0 %v1264_v48  ;;  %v374_v48 = vpack.c.bf16 %v360_v44, %v359_v43  ;;  %v715_v43 = vld [vmem:[#allocation2 + $0x68] sm:$0xff] }
 0x129   : > { %v1072_v52 = vpop.f32.mrb[0].mxu0 }
 0x12a   : > { %v1073_v53 = vpop.f32.mrb[1].mxu0 }
 0x12b   : > { %v1074_v54 = vadd.f32 %v1073_v53, %v1072_v52  ;;  %v1075_v55 = vpop.f32.mrb[2].mxu0  ;;  %v365_v52 = vld [vmem:[%s1440_s15 + $0x40] sm:$0xff]  ;;  %v366_v53 = vld [vmem:[%s1440_s15 + $0x48] sm:$0xff] }
 0x12c   : > { %v1076_v56 = vpop.f32.mrb[3].mxu0 }
 0x12d   : > { %v1077_v57 = vadd.f32 %v1076_v56, %v1075_v55  ;;  %v377_v55 = vpack.c.bf16 %v366_v53, %v365_v52  ;;  %v367_v56 = vld [vmem:[%s1440_s15 + $0x50] sm:$0xff] }
 0x12f   : > { %v718_v58 = vpack.c.bf16 %v1077_v57, %v1074_v54  ;;  %v376_v54 = vpack.c.bf16 %v364_v51, %v363_v50  ;;  %v368_v57 = vld [vmem:[%s1440_s15 + $0x58] sm:$0xff]  ;;  %v1051_v50 = vld [vmem:[%s1567_s3] ss:$0 sm:$0xff] (!%p1050_p13) }
 0x131   : > { %v1078_v59 = vpop.f32.mrb[4].mxu0  ;;  %1136 = vmatprep.subr.bf16.mxu1 %v718_v58 }
 0x132   : > { %v1079_v60 = vpop.f32.mrb[5].mxu0  ;;  %1137 = vmatpush3.bf16.msra.mxu1 %v718_v58  ;;  %v369_v58 = vld [vmem:[%s1440_s15 + $0x60] sm:$0xff] }
 0x133   : > { %v1080_v61 = vadd.f32 %v1079_v60, %v1078_v59  ;;  %v1081_v62 = vpop.f32.mrb[6].mxu0  ;;  %v370_v59 = vld [vmem:[%s1440_s15 + $0x68] sm:$0xff]  ;;  %v378_v60 = vpack.c.bf16 %v368_v57, %v367_v56 }
 0x134   : > { %v1082_v63 = vpop.f32.mrb[7].mxu0 }
 0x135   : > { %v1083_v0 = vadd.f32 %v1082_v63, %v1081_v62  ;;  %v371_v62 = vld [vmem:[%s1440_s15 + $0x70] sm:$0xff]  ;;  %v372_v63 = vld [vmem:[%s1440_s15 + $0x78] sm:$0xff] }
 0x137   : > { %v719_v1 = vpack.c.bf16 %v1083_v0, %v1080_v61  ;;  %v379_v61 = vpack.c.bf16 %v370_v59, %v369_v58  ;;  %v380_v0 = vpack.c.bf16 %v372_v63, %v371_v62 }
 0x139   : > { %v1084_v2 = vpop.f32.mrb[8].mxu0  ;;  %1138 = vmatprep.subr.bf16.mxu1 %v719_v1 }
 0x13a   : > { %v1085_v3 = vpop.f32.mrb[9].mxu0  ;;  %1139 = vmatpush3.bf16.msra.mxu1 %v719_v1  ;;  %v704_v1 = vld [vmem:[#allocation2 + $0x10] sm:$0xff] }
 0x13b   : > { %v1086_v4 = vadd.f32 %v1085_v3, %v1084_v2  ;;  %v1087_v5 = vpop.f32.mrb[10].mxu0  ;;  %v702_v2 = vld [vmem:[#allocation2] sm:$0xff] }
 0x13c   : > { %v1088_v6 = vpop.f32.mrb[11].mxu0 }
 0x13d   : > { %v1089_v7 = vadd.f32 %v1088_v6, %v1087_v5 }
 0x13f   : > { %v720_v8 = vpack.c.bf16 %v1089_v7, %v1086_v4  ;;  %v705_v4 = vld [vmem:[#allocation2 + $0x18] sm:$0xff]  ;;  %v703_v7 = vld [vmem:[#allocation2 + $0x8] sm:$0xff] }
 0x141   : > { %v1090_v9 = vpop.f32.mrb[12].mxu0  ;;  %1140 = vmatprep.subr.bf16.mxu1 %v720_v8 }
 0x142   : > { %v1091_v10 = vpop.f32.mrb[13].mxu0  ;;  %1141 = vmatpush3.bf16.msra.mxu1 %v720_v8 }
 0x143   : > { %v1092_v11 = vadd.f32 %v1091_v10, %v1090_v9  ;;  %v1093_v12 = vpop.f32.mrb[14].mxu0 }
 0x144   : > { %v1094_v13 = vpop.f32.mrb[15].mxu0 }
 0x145   : > { %v1095_v14 = vadd.f32 %v1094_v13, %v1093_v12  ;;  %v708_v13 = vld [vmem:[#allocation2 + $0x30] sm:$0xff] }
 0x147   : > { %v721_v15 = vpack.c.bf16 %v1095_v14, %v1092_v11  ;;  %v706_v14 = vld [vmem:[#allocation2 + $0x20] sm:$0xff] }
 0x149   : > { %v1096_v16 = vpop.f32.mrb[16].mxu0  ;;  %1142 = vmatprep.subr.bf16.mxu1 %v721_v15 }
 0x14a   : > { %v1097_v17 = vpop.f32.mrb[17].mxu0  ;;  %1143 = vmatpush3.bf16.msra.mxu1 %v721_v15 }
 0x14b   : > { %v1098_v18 = vadd.f32 %v1097_v17, %v1096_v16  ;;  %v1099_v19 = vpop.f32.mrb[18].mxu0  ;;  %v709_v16 = vld [vmem:[#allocation2 + $0x38] sm:$0xff] }
 0x14c   : > { %v1100_v20 = vpop.f32.mrb[19].mxu0 }
 0x14d   : > { %v1101_v21 = vadd.f32 %v1100_v20, %v1099_v19  ;;  %v707_v19 = vld [vmem:[#allocation2 + $0x28] sm:$0xff] }
 0x14f   : > { %v722_v22 = vpack.c.bf16 %v1101_v21, %v1098_v18 }
 0x151   : > { %v1102_v23 = vpop.f32.mrb[20].mxu0  ;;  %1144 = vmatprep.subr.bf16.mxu1 %v722_v22 }
 0x152   : > { %v1103_v24 = vpop.f32.mrb[21].mxu0  ;;  %1145 = vmatpush3.bf16.msra.mxu1 %v722_v22 }
 0x153   : > { %v1104_v25 = vadd.f32 %v1103_v24, %v1102_v23  ;;  %v1105_v26 = vpop.f32.mrb[22].mxu0 }
 0x154   : > { %v1106_v27 = vpop.f32.mrb[23].mxu0 }
 0x155   : > { %v1107_v28 = vadd.f32 %v1106_v27, %v1105_v26  ;;  %v710_v26 = vld [vmem:[#allocation2 + $0x40] sm:$0xff] }
 0x157   : > { %v723_v29 = vpack.c.bf16 %v1107_v28, %v1104_v25  ;;  %v712_v25 = vld [vmem:[#allocation2 + $0x50] sm:$0xff]  ;;  %v713_v28 = vld [vmem:[#allocation2 + $0x58] sm:$0xff] }
 0x159   : > { %v1108_v30 = vpop.f32.mrb[24].mxu0  ;;  %1146 = vmatprep.subr.bf16.mxu1 %v723_v29 }
 0x15a   : > { %v1109_v31 = vpop.f32.mrb[25].mxu0  ;;  %1147 = vmatpush3.bf16.msra.mxu1 %v723_v29 }
 0x15b   : > { %v1110_v32 = vadd.f32 %v1109_v31, %v1108_v30  ;;  %v1111_v33 = vpop.f32.mrb[26].mxu0  ;;  %v711_v31 = vld [vmem:[#allocation2 + $0x48] sm:$0xff] }
 0x15c   : > { %v1112_v34 = vpop.f32.mrb[27].mxu0 }
 0x15d   : > { %v1113_v35 = vadd.f32 %v1112_v34, %v1111_v33 }
 0x15f   : > { %v724_v36 = vpack.c.bf16 %v1113_v35, %v1110_v32 }
 0x161   : > { %v1114_v37 = vpop.f32.mrb[28].mxu0  ;;  %1148 = vmatprep.subr.bf16.mxu1 %v724_v36 }
 0x162   : > { %v1115_v38 = vpop.f32.mrb[29].mxu0  ;;  %1149 = vmatpush3.bf16.msra.mxu1 %v724_v36 }
 0x163   : > { %v1116_v39 = vadd.f32 %v1115_v38, %v1114_v37  ;;  %v1117_v40 = vpop.f32.mrb[30].mxu0  ;;  %v716_v37 = vld [vmem:[#allocation2 + $0x70] sm:$0xff]  ;;  %v714_v38 = vld [vmem:[#allocation2 + $0x60] sm:$0xff] }
 0x164   : > { %v1118_v41 = vpop.f32.mrb[31].mxu0 }
 0x165   : > { %v1119_v42 = vadd.f32 %v1118_v41, %v1117_v40  ;;  %v717_v40 = vld [vmem:[#allocation2 + $0x78] sm:$0xff] }
 0x167   : > { %v725_v45 = vpack.c.bf16 %v1119_v42, %v1116_v39 }
 0x169   : > { %1150 = vmatprep.subr.bf16.mxu1 %v725_v45 }
 0x16a   : > { %1151 = vmatpush3.bf16.msra.mxu1 %v725_v45 }
 0x16d   : > { %1153 = vmatmul.mubr.bf16.vlgmr.msra.gmra.mrb[0].mxu1 %v374_v48 }
 0x16e   : > { %1156 = vmatprep.mubr.bf16.mxu1 %v375_v49 }
 0x175   : > { %1157 = vmatmul.mubr.bf16.gmra.mrb[4].mxu1 %v376_v54 }
 0x176   : > { %1160 = vmatprep.mubr.bf16.mxu1 %v377_v55 }
 0x17d   : > { %1161 = vmatmul.mubr.bf16.gmra.mrb[8].mxu1 %v378_v60 }
 0x17e   : > { %1164 = vmatprep.mubr.bf16.mxu1 %v379_v61 }
 0x185   : > { %1165 = vmatmul.mubr.bf16.gmra.mrb[12].mxu1 %v380_v0 }
 0x240   : > { %v1154_v3 = vpop.f32.mrb[0].mxu1 }
 0x241   : > { %v825_v5 = vadd.f32 %v1154_v3, %v704_v1  ;;  %v760_v6 = vpop.f32.mrb[1].mxu1 }
 0x242   : > { %v823_v8 = vadd.f32 %v760_v6, %v702_v2  ;;  %v1155_v9 = vpop.f32.mrb[2].mxu1 }
 0x243   : > { %841 = vst [vmem:[#allocation2 + $0x10] sm:$0xff] %v825_v5  ;;  %v826_v10 = vadd.f32 %v1155_v9, %v705_v4  ;;  %v763_v11 = vpop.f32.mrb[3].mxu1 }
 0x244   : > { %839 = vst [vmem:[#allocation2] sm:$0xff] %v823_v8  ;;  %v824_v12 = vadd.f32 %v763_v11, %v703_v7 }
 0x245   : > { %842 = vst [vmem:[#allocation2 + $0x18] sm:$0xff] %v826_v10 }
 0x246   : > { %840 = vst [vmem:[#allocation2 + $0x8] sm:$0xff] %v824_v12 }
 0x248   : > { %v1158_v15 = vpop.f32.mrb[4].mxu1 }
 0x249   : > { %v829_v17 = vadd.f32 %v1158_v15, %v708_v13  ;;  %v776_v18 = vpop.f32.mrb[5].mxu1 }
 0x24a   : > { %v827_v20 = vadd.f32 %v776_v18, %v706_v14  ;;  %v1159_v21 = vpop.f32.mrb[6].mxu1  ;;  %v861_v54 = vld [vmem:[#allocation2 + $0x10] sm:$0xff] (!%p1050_p13) }
 0x24b   : > { %845 = vst [vmem:[#allocation2 + $0x30] sm:$0xff] %v829_v17  ;;  %v830_v22 = vadd.f32 %v1159_v21, %v709_v16  ;;  %v779_v23 = vpop.f32.mrb[7].mxu1  ;;  %v859_v49 = vld [vmem:[#allocation2] sm:$0xff] (!%p1050_p13)  ;;  %v884_v57 = vadd.f32 (!%p1050_p13), %v1051_v50, %v861_v54 }
 0x24c   : > { %843 = vst [vmem:[#allocation2 + $0x20] sm:$0xff] %v827_v20  ;;  %v828_v24 = vadd.f32 %v779_v23, %v707_v19  ;;  %v882_v52 = vadd.f32 (!%p1050_p13), %v1051_v50, %v859_v49  ;;  %v862_v55 = vld [vmem:[#allocation2 + $0x18] sm:$0xff] (!%p1050_p13) }
 0x24d   : > { %846 = vst [vmem:[#allocation2 + $0x38] sm:$0xff] %v830_v22  ;;  %v860_v51 = vld [vmem:[#allocation2 + $0x8] sm:$0xff] (!%p1050_p13)  ;;  %v885_v58 = vadd.f32 (!%p1050_p13), %v1051_v50, %v862_v55  ;;  %900 = vst [vmem:[%s1438_s7 + $0x10] sm:$0xff] (!%p1050_p13), %v884_v57 }
 0x24e   : > { %844 = vst [vmem:[#allocation2 + $0x28] sm:$0xff] %v828_v24  ;;  %v883_v53 = vadd.f32 (!%p1050_p13), %v1051_v50, %v860_v51  ;;  %898 = vst [vmem:[%s1438_s7] sm:$0xff] (!%p1050_p13), %v882_v52 }
 0x24f   : > { %901 = vst [vmem:[%s1438_s7 + $0x18] sm:$0xff] (!%p1050_p13), %v885_v58 }
 0x250   : > { %v1162_v27 = vpop.f32.mrb[8].mxu1  ;;  %899 = vst [vmem:[%s1438_s7 + $0x8] sm:$0xff] (!%p1050_p13), %v883_v53 }
 0x251   : > { %v833_v29 = vadd.f32 %v1162_v27, %v712_v25  ;;  %v792_v30 = vpop.f32.mrb[9].mxu1 }
 0x252   : > { %v831_v32 = vadd.f32 %v792_v30, %v710_v26  ;;  %v1163_v33 = vpop.f32.mrb[10].mxu1  ;;  %v865_v61 = vld [vmem:[#allocation2 + $0x30] sm:$0xff] (!%p1050_p13) }
 0x253   : > { %849 = vst [vmem:[#allocation2 + $0x50] sm:$0xff] %v833_v29  ;;  %v834_v34 = vadd.f32 %v1163_v33, %v713_v28  ;;  %v795_v35 = vpop.f32.mrb[11].mxu1  ;;  %v863_v56 = vld [vmem:[#allocation2 + $0x20] sm:$0xff] (!%p1050_p13)  ;;  %v888_v0 = vadd.f32 (!%p1050_p13), %v1051_v50, %v865_v61 }
 0x254   : > { %847 = vst [vmem:[#allocation2 + $0x40] sm:$0xff] %v831_v32  ;;  %v832_v36 = vadd.f32 %v795_v35, %v711_v31  ;;  %v886_v59 = vadd.f32 (!%p1050_p13), %v1051_v50, %v863_v56  ;;  %v866_v62 = vld [vmem:[#allocation2 + $0x38] sm:$0xff] (!%p1050_p13) }
 0x255   : > { %850 = vst [vmem:[#allocation2 + $0x58] sm:$0xff] %v834_v34  ;;  %v864_v60 = vld [vmem:[#allocation2 + $0x28] sm:$0xff] (!%p1050_p13)  ;;  %v889_v1 = vadd.f32 (!%p1050_p13), %v1051_v50, %v866_v62  ;;  %904 = vst [vmem:[%s1438_s7 + $0x30] sm:$0xff] (!%p1050_p13), %v888_v0 }
 0x256   : > { %848 = vst [vmem:[#allocation2 + $0x48] sm:$0xff] %v832_v36  ;;  %v887_v63 = vadd.f32 (!%p1050_p13), %v1051_v50, %v864_v60  ;;  %902 = vst [vmem:[%s1438_s7 + $0x20] sm:$0xff] (!%p1050_p13), %v886_v59 }
 0x257   : > { %905 = vst [vmem:[%s1438_s7 + $0x38] sm:$0xff] (!%p1050_p13), %v889_v1 }
 0x258   : > { %v1166_v39 = vpop.f32.mrb[12].mxu1  ;;  %858 = sbr.rel (%p1050_p13) target bundleno = 617 (0x269), region = 82  ;;  %903 = vst [vmem:[%s1438_s7 + $0x28] sm:$0xff] (!%p1050_p13), %v887_v63 }
 0x259   : > { %v837_v41 = vadd.f32 %v1166_v39, %v716_v37  ;;  %v808_v42 = vpop.f32.mrb[13].mxu1 }
 0x25a   : > { %v835_v44 = vadd.f32 %v808_v42, %v714_v38  ;;  %v1167_v45 = vpop.f32.mrb[14].mxu1  ;;  %v869_v4 = vld [vmem:[#allocation2 + $0x50] sm:$0xff] (!%p1050_p13) }
 0x25b   : > { %853 = vst [vmem:[#allocation2 + $0x70] sm:$0xff] %v837_v41  ;;  %v838_v46 = vadd.f32 %v1167_v45, %v717_v40  ;;  %v811_v47 = vpop.f32.mrb[15].mxu1  ;;  %v867_v2 = vld [vmem:[#allocation2 + $0x40] sm:$0xff] (!%p1050_p13)  ;;  %v892_v7 = vadd.f32 (!%p1050_p13), %v1051_v50, %v869_v4 }
 0x25c   : > { %851 = vst [vmem:[#allocation2 + $0x60] sm:$0xff] %v835_v44  ;;  %v836_v48 = vadd.f32 %v811_v47, %v715_v43  ;;  %v890_v5 = vadd.f32 (!%p1050_p13), %v1051_v50, %v867_v2  ;;  %v870_v8 = vld [vmem:[#allocation2 + $0x58] sm:$0xff] (!%p1050_p13) }
 0x25d   : > { %854 = vst [vmem:[#allocation2 + $0x78] sm:$0xff] %v838_v46  ;;  %v868_v3 = vld [vmem:[#allocation2 + $0x48] sm:$0xff] (!%p1050_p13)  ;;  %v893_v11 = vadd.f32 (!%p1050_p13), %v1051_v50, %v870_v8  ;;  %908 = vst [vmem:[%s1438_s7 + $0x50] sm:$0xff] (!%p1050_p13), %v892_v7 }
 0x25e   : > { %852 = vst [vmem:[#allocation2 + $0x68] sm:$0xff] %v836_v48  ;;  %v891_v6 = vadd.f32 (!%p1050_p13), %v1051_v50, %v868_v3  ;;  %906 = vst [vmem:[%s1438_s7 + $0x40] sm:$0xff] (!%p1050_p13), %v890_v5 }
 0x25f   : > { %909 = vst [vmem:[%s1438_s7 + $0x58] sm:$0xff] %v893_v11 }
 0x260   : > { %907 = vst [vmem:[%s1438_s7 + $0x48] sm:$0xff] %v891_v6 }
 0x262   : > { %v873_v14 = vld [vmem:[#allocation2 + $0x70] sm:$0xff] }
 0x263   : > { %v871_v9 = vld [vmem:[#allocation2 + $0x60] sm:$0xff]  ;;  %v896_v16 = vadd.f32 %v1051_v50, %v873_v14 }
 0x264   : > { %v894_v12 = vadd.f32 %v1051_v50, %v871_v9  ;;  %v874_v15 = vld [vmem:[#allocation2 + $0x78] sm:$0xff] }
 0x265   : > { %v872_v10 = vld [vmem:[#allocation2 + $0x68] sm:$0xff]  ;;  %v897_v17 = vadd.f32 %v1051_v50, %v874_v15  ;;  %912 = vst [vmem:[%s1438_s7 + $0x70] sm:$0xff] %v896_v16 }
 0x266   : > { %v895_v13 = vadd.f32 %v1051_v50, %v872_v10  ;;  %910 = vst [vmem:[%s1438_s7 + $0x60] sm:$0xff] %v894_v12 }
 0x267   : > { %913 = vst [vmem:[%s1438_s7 + $0x78] sm:$0xff] %v897_v17 }
 0x268   : > { %911 = vst [vmem:[%s1438_s7 + $0x68] sm:$0xff] %v895_v13 }
 0x269 PF: > { %s14_s21 = sadd.s32 1, %s1319_s21   ;;  %s1569_s15 = smov %s1299_s16 }
 0x26a   : > { %p11_p0 = scmp.ge.s32.totalorder %s14_s21, 6   ;;  %s1570_s16 = smov %s1398_s28 }
 0x26b   : > { %s1571_s17 = smov %s1311_s19  ;;  %s1572_s18 = smov %s1315_s20 }
 0x26c   : > { %s1573_s19 = smov %s1576_s22  ;;  %s1574_s20 = smov %s1580_s23 }
 0x26d   :  { %13 = sbr.rel (!%p11_p0) target bundleno = 4 (0x4), region = 120 }

</bundles_post_ra>
